<compile_context>
chip_gen: v7x
topology: tpu7x:2x2x1
jax: 0.10.0
libtpu: 0.0.40
codegen_flags: <defaults>
</compile_context>

<pallas_src>
import functools

import jax
import jax.numpy as jnp
from jax.experimental import pallas as pl
from jax.experimental.pallas import tpu as pltpu

_LANE = 128
_MIB = 1024 * 1024


def _vmem_capacity_bytes():
    """Physical per-core VMEM; conservative (v7x, 64 MiB) if the query fails."""
    try:
        cap = int(getattr(pltpu.get_tpu_info(), "vmem_capacity_bytes", 0))
        if cap > 0:
            return cap
    except Exception:
        pass
    return 64 * _MIB


def _affine(v, w_ref, b_ref):
    """Batched tiny mat-vec: v (B, K) @ w (N, K)^T + b (1, N) -> (B, N), f32."""
    w = w_ref[...].astype(jnp.float32)
    b = b_ref[...].astype(jnp.float32)
    if w.shape[0] * w.shape[1] >= 128 * 128:
        # Production-size C: MXU matmul avoids the (B, N, K) f32 temporary.
        return jnp.dot(v, w.T, preferred_element_type=jnp.float32) + b
    # Tiny MLP: broadcast-multiply (VPU) + lane reduce (XLU); no N=1 MXU pass.
    return jnp.sum(v[:, None, :] * w[None, :, :], axis=-1) + b


def _fused_gate(pooled, w1_ref, b1_ref, w2_ref, b2_ref,
                w3_ref, b3_ref, w4_ref, b4_ref):
    """pooled = mean_hw(x) (B, C) f32 -> fused gate s_att * c_att (B, C) f32."""
    h1 = jnp.maximum(_affine(pooled, w1_ref, b1_ref), 0.0)        # (B, C//8)
    s_att = jax.nn.sigmoid(_affine(h1, w2_ref, b2_ref))           # (B, C)
    pooled2 = s_att * pooled          # exact: mean(x*s) == s*mean(x)
    h2 = jnp.maximum(_affine(pooled2, w3_ref, b3_ref), 0.0)       # (B, C//4)
    c_att = jax.nn.sigmoid(_affine(h2, w4_ref, b4_ref))           # (B, C)
    return s_att * c_att


# --------------------------- fused (VMEM-resident) path ----------------------

def fused_kernel(x_ref, w1_ref, b1_ref, w2_ref, b2_ref,
                 w3_ref, b3_ref, w4_ref, b4_ref, o_ref, *, inv_hw):
    """x resident in VMEM: pooled -> gate -> o = x * gate, one HBM round-trip."""
    x = x_ref[...].astype(jnp.float32)                            # (B, C, HW)
    pooled = jnp.sum(x, axis=-1) * inv_hw                         # (B, C)
    gate = _fused_gate(pooled, w1_ref, b1_ref, w2_ref, b2_ref,
                       w3_ref, b3_ref, w4_ref, b4_ref)            # (B, C) f32
    o_ref[...] = (x * gate[:, :, None]).astype(o_ref.dtype)


# --------------------------- streaming path: pass 1 --------------------------

def gate_kernel(x_ref, w1_ref, b1_ref, w2_ref, b2_ref,
                w3_ref, b3_ref, w4_ref, b4_ref,
                gate_ref, acc_ref, *, inv_hw, hw, t_hw):
    """Per-batch spatial sum over HW tiles, then the fused gate on the last tile."""
    t = pl.program_id(1)

    @pl.when(t == 0)
    def _init():
        acc_ref[...] = jnp.zeros_like(acc_ref)

    x = x_ref[...].astype(jnp.float32)                            # (1, C, T)
    if hw % t_hw:  # ragged tail handled in-kernel (no XLA pad of x)
        lane = jax.lax.broadcasted_iota(jnp.int32, x.shape, 2)
        x = jnp.where(t * t_hw + lane < hw, x, 0.0)
    acc_ref[...] += jnp.sum(x, axis=-1)                           # (1, C)

    @pl.when(t == pl.num_programs(1) - 1)
    def _finalize():
        pooled = acc_ref[...] * inv_hw                            # (1, C)
        gate_ref[0] = _fused_gate(pooled, w1_ref, b1_ref, w2_ref, b2_ref,
                                  w3_ref, b3_ref, w4_ref, b4_ref)  # (1, C)


# --------------------------- streaming path: pass 2 --------------------------

def apply_kernel(gate_ref, x_ref, o_ref):
    """o = x * gate; gate kept in f32, multiply in f32, cast once on store."""
    # gate_ref: (1, C, 1) f32, x_ref/o_ref: (1, C, T)
    o_ref[0] = (x_ref[0].astype(jnp.float32) * gate_ref[0]).astype(o_ref.dtype)


# --------------------------------- wrapper -----------------------------------

def _pick_hw_tile(hw, rows, itemsize, target_bytes):
    """Largest lane-dense tile (multiple of 128) <= target; no divisibility
    requirement on hw (ragged tails are masked / OOB writes dropped)."""
    hw_up = pl.cdiv(hw, _LANE) * _LANE
    per_lane = max(1, rows * itemsize)
    max_t = max(_LANE, (int(target_bytes) // per_lane) // _LANE * _LANE)
    return min(hw_up, max_t)


def attention_module(x, params, *, force_path=None):
    """x: NCHW [B, C, H, W]. params in PyTorch layouts. Returns same shape."""
    B, C, H, W = x.shape
    HW = H * W
    dtype = x.dtype
    itemsize = jnp.dtype(dtype).itemsize

    w1, b1, w2, b2, w3, b3, w4, b4 = params
    C8 = w1.shape[0]
    C4 = w3.shape[0]

    # PyTorch layouts -> 2-D weights / row biases (tiny one-time XLA reshapes).
    w1m = jnp.asarray(w1).reshape(C8, C)
    w2m = jnp.asarray(w2).reshape(C, C8)
    w3m = jnp.asarray(w3).reshape(C4, C)
    w4m = jnp.asarray(w4).reshape(C, C4)
    b1r = jnp.asarray(b1).reshape(1, C8)
    b2r = jnp.asarray(b2).reshape(1, C)
    b3r = jnp.asarray(b3).reshape(1, C4)
    b4r = jnp.asarray(b4).reshape(1, C)
    weights = (w1m, b1r, w2m, b2r, w3m, b3r, w4m, b4r)
    w_shapes = [(C8, C), (1, C8), (C, C8), (1, C),
                (C4, C), (1, C4), (C, C4), (1, C)]
    weight_bytes = sum(a.size * a.dtype.itemsize for a in weights)

    # (B, C, HW): pure metadata reshape, no copy, no padding.
    x_flat = x.reshape(B, C, HW)
    x_bytes = B * C * HW * itemsize
    f32_extra = 0 if dtype == jnp.float32 else B * C * HW * 4

    # VMEM budgets scale with the chip: ~48 MiB limit on v7x (64 MiB VMEM),
    # ~96 MiB on v5e/v6e (128 MiB VMEM).
    vmem_cap = _vmem_capacity_bytes()
    fused_limit = min(vmem_cap - 8 * _MIB, 112 * _MIB)
    fused_need = (5 * x_bytes) // 2 + f32_extra + weight_bytes + 2 * _MIB
    stream_limit = min(vmem_cap * 3 // 4, 96 * _MIB)

    use_fused = fused_need <= fused_limit
    if force_path == "fused":
        use_fused = True
    elif force_path == "streaming":
        use_fused = False

    # ---------------- fast path: whole x resident in VMEM --------------------
    if use_fused:
        out = pl.pallas_call(
            functools.partial(fused_kernel, inv_hw=1.0 / HW),
            out_shape=jax.ShapeDtypeStruct((B, C, HW), dtype),
            compiler_params=pltpu.CompilerParams(
                vmem_limit_bytes=int(fused_limit)),
        )(x_flat, *weights)
        return out.reshape(B, C, H, W)

    # ---------------- streaming fallback: two HBM-bound passes ---------------
    # Big lane-dense tiles (~8 MiB) reach ~85% of HBM roofline and amortize the
    # per-grid-step overhead; pass-2 footprint ~= 4 x tile (double-buffered
    # x + o), which stays inside stream_limit on every generation.
    tile_target = min(8 * _MIB, stream_limit // 5)
    t_hw = _pick_hw_tile(HW, C, itemsize, tile_target)
    n_hw = pl.cdiv(HW, t_hw)

    w_specs = [pl.BlockSpec(s, lambda b, t: (0, 0)) for s in w_shapes]

    # pass 1: per-batch pooled reduction + fused gate, batch axis parallel so
    # both v7x TensorCores drive the reduction.
    gate = pl.pallas_call(
        functools.partial(gate_kernel, inv_hw=1.0 / HW, hw=HW, t_hw=t_hw),
        out_shape=jax.ShapeDtypeStruct((B, 1, C), jnp.float32),
        grid_spec=pltpu.PrefetchScalarGridSpec(
            num_scalar_prefetch=0,
            grid=(B, n_hw),
            in_specs=[pl.BlockSpec((1, C, t_hw), lambda b, t: (b, 0, t))]
                     + w_specs,
            out_specs=pl.BlockSpec((1, 1, C), lambda b, t: (b, 0, 0)),
            scratch_shapes=[pltpu.VMEM((1, C), jnp.float32)],
        ),
        compiler_params=pltpu.CompilerParams(
            dimension_semantics=("parallel", "arbitrary"),
            vmem_limit_bytes=int(stream_limit),
        ),
    )(x_flat, *weights)

    # pass 2: single read-gate-write streaming pass, o = x * gate (gate in f32).
    gate3 = gate.reshape(B, C, 1)   # (B,1,C) -> (B,C,1): order-preserving, tiny
    out = pl.pallas_call(
        apply_kernel,
        out_shape=jax.ShapeDtypeStruct((B, C, HW), dtype),
        grid_spec=pltpu.PrefetchScalarGridSpec(
            num_scalar_prefetch=0,
            grid=(B, n_hw),
            in_specs=[
                pl.BlockSpec((1, C, 1), lambda b, t: (b, 0, 0)),       # gate
                pl.BlockSpec((1, C, t_hw), lambda b, t: (b, 0, t)),    # x
            ],
            out_specs=pl.BlockSpec((1, C, t_hw), lambda b, t: (b, 0, t)),
        ),
        compiler_params=pltpu.CompilerParams(
            dimension_semantics=("parallel", "parallel"),
            vmem_limit_bytes=int(stream_limit),
        ),
    )(gate3, x_flat)

    return out.reshape(B, C, H, W)


# --------------------------------- reference ----------------------------------

def reference(x, params):
    """Plain-JAX reference matching the PyTorch forward semantics."""
    w1, b1, w2, b2, w3, b3, w4, b4 = params
    B, C, H, W = x.shape
    C8, C4 = w1.shape[0], w3.shape[0]
    hp = jax.lax.Precision.HIGHEST
    pooled = jnp.mean(x, axis=(2, 3))                              # (B, C)
    h1 = jax.nn.relu(jnp.dot(pooled, w1.reshape(C8, C).T, precision=hp) + b1)
    s_att = jax.nn.sigmoid(jnp.dot(h1, w2.reshape(C, C8).T, precision=hp) + b2)
    x2 = x * s_att[:, :, None, None]
    pooled2 = jnp.mean(x2, axis=(2, 3))
    h2 = jax.nn.relu(jnp.dot(pooled2, w3.T, precision=hp) + b3)
    c_att = jax.nn.sigmoid(jnp.dot(h2, w4.T, precision=hp) + b4)
    return x2 * c_att[:, :, None, None]


if __name__ == "__main__":
    B, C, H, W = 2, 32, 16, 16          # feature_dim = 32 -> C//8 = 4, C//4 = 8
    C8, C4 = C // 8, C // 4

    key = jax.random.PRNGKey(0)
    keys = jax.random.split(key, 9)
    scale = 0.1
    x = jax.random.normal(keys[0], (B, C, H, W), jnp.float32)
    # Parameters in native PyTorch layouts (Conv2d 1x1 weights are 4-D).
    w1 = jax.random.normal(keys[1], (C8, C, 1, 1), jnp.float32) * scale
    b1 = jax.random.normal(keys[2], (C8,), jnp.float32) * scale
    w2 = jax.random.normal(keys[3], (C, C8, 1, 1), jnp.float32) * scale
    b2 = jax.random.normal(keys[4], (C,), jnp.float32) * scale
    w3 = jax.random.normal(keys[5], (C4, C), jnp.float32) * scale
    b3 = jax.random.normal(keys[6], (C4,), jnp.float32) * scale
    w4 = jax.random.normal(keys[7], (C, C4), jnp.float32) * scale
    b4 = jax.random.normal(keys[8], (C,), jnp.float32) * scale
    params = (w1, b1, w2, b2, w3, b3, w4, b4)

    ref = reference(x, params)

    # Default (fused, VMEM-resident) path.
    out_fused = jax.block_until_ready(attention_module(x, params))
    assert out_fused.shape == (B, C, H, W)
    err_f = float(jnp.max(jnp.abs(out_fused - ref)))
    assert jnp.allclose(out_fused, ref, atol=1e-5, rtol=1e-5), err_f

    # Streaming (two-pass) path, exercised explicitly for coverage.
    out_stream = jax.block_until_ready(
        attention_module(x, params, force_path="streaming"))
    err_s = float(jnp.max(jnp.abs(out_stream - ref)))
    assert jnp.allclose(out_stream, ref, atol=1e-5, rtol=1e-5), err_s

    print("KERNEL_OK")
</pallas_src>

<mosaic_0001>
module attributes {stable_mosaic.version = 11 : i64} {
  func.func @fused_kernel(%arg0: memref<2x32x256xf32, #tpu.memory_space<vmem>>, %arg1: memref<4x32xf32, #tpu.memory_space<vmem>>, %arg2: memref<1x4xf32, #tpu.memory_space<vmem>>, %arg3: memref<32x4xf32, #tpu.memory_space<vmem>>, %arg4: memref<1x32xf32, #tpu.memory_space<vmem>>, %arg5: memref<8x32xf32, #tpu.memory_space<vmem>>, %arg6: memref<1x8xf32, #tpu.memory_space<vmem>>, %arg7: memref<32x8xf32, #tpu.memory_space<vmem>>, %arg8: memref<1x32xf32, #tpu.memory_space<vmem>>, %arg9: memref<2x32x256xf32, #tpu.memory_space<vmem>>) attributes {dimension_semantics = [], scalar_prefetch = 0 : i64, scratch_operands = 0 : i64, tpu.core_type = #tpu.core_type<tc>} {
    %c0 = arith.constant 0 : index
    %c0_0 = arith.constant 0 : index
    %c0_1 = arith.constant 0 : index
    %0 = vector.load %arg0[%c0, %c0_0, %c0_1] : memref<2x32x256xf32, #tpu.memory_space<vmem>>, vector<2x32x256xf32>
    %cst = arith.constant dense<0.000000e+00> : vector<2x32xf32>
    %1 = vector.multi_reduction <add>, %0, %cst [2] : vector<2x32x256xf32> to vector<2x32xf32>
    %cst_2 = arith.constant 3.906250e-03 : f32
    %2 = vector.broadcast %cst_2 : f32 to vector<2x32xf32>
    %3 = arith.mulf %1, %2 : vector<2x32xf32>
    %c0_3 = arith.constant 0 : index
    %c0_4 = arith.constant 0 : index
    %4 = vector.load %arg1[%c0_3, %c0_4] : memref<4x32xf32, #tpu.memory_space<vmem>>, vector<4x32xf32>
    %c0_5 = arith.constant 0 : index
    %c0_6 = arith.constant 0 : index
    %5 = vector.load %arg2[%c0_5, %c0_6] : memref<1x4xf32, #tpu.memory_space<vmem>>, vector<1x4xf32>
    %6 = vector.shape_cast %3 : vector<2x32xf32> to vector<2x1x32xf32>
    %7 = vector.shape_cast %4 : vector<4x32xf32> to vector<1x4x32xf32>
    %8 = vector.broadcast %6 : vector<2x1x32xf32> to vector<2x4x32xf32>
    %9 = vector.broadcast %7 : vector<1x4x32xf32> to vector<2x4x32xf32>
    %10 = arith.mulf %8, %9 : vector<2x4x32xf32>
    %cst_7 = arith.constant dense<0.000000e+00> : vector<2x4xf32>
    %11 = vector.multi_reduction <add>, %10, %cst_7 [2] : vector<2x4x32xf32> to vector<2x4xf32>
    %12 = vector.broadcast %5 : vector<1x4xf32> to vector<2x4xf32>
    %13 = arith.addf %11, %12 : vector<2x4xf32>
    %cst_8 = arith.constant 0.000000e+00 : f32
    %14 = vector.broadcast %cst_8 : f32 to vector<2x4xf32>
    %15 = arith.maximumf %13, %14 : vector<2x4xf32>
    %c0_9 = arith.constant 0 : index
    %c0_10 = arith.constant 0 : index
    %16 = vector.load %arg3[%c0_9, %c0_10] : memref<32x4xf32, #tpu.memory_space<vmem>>, vector<32x4xf32>
    %c0_11 = arith.constant 0 : index
    %c0_12 = arith.constant 0 : index
    %17 = vector.load %arg4[%c0_11, %c0_12] : memref<1x32xf32, #tpu.memory_space<vmem>>, vector<1x32xf32>
    %18 = vector.shape_cast %15 : vector<2x4xf32> to vector<2x1x4xf32>
    %19 = vector.shape_cast %16 : vector<32x4xf32> to vector<1x32x4xf32>
    %20 = vector.broadcast %18 : vector<2x1x4xf32> to vector<2x32x4xf32>
    %21 = vector.broadcast %19 : vector<1x32x4xf32> to vector<2x32x4xf32>
    %22 = arith.mulf %20, %21 : vector<2x32x4xf32>
    %cst_13 = arith.constant dense<0.000000e+00> : vector<2x32xf32>
    %23 = vector.multi_reduction <add>, %22, %cst_13 [2] : vector<2x32x4xf32> to vector<2x32xf32>
    %24 = vector.broadcast %17 : vector<1x32xf32> to vector<2x32xf32>
    %25 = arith.addf %23, %24 : vector<2x32xf32>
    %26 = arith.negf %25 : vector<2x32xf32>
    %27 = math.exp %26 : vector<2x32xf32>
    %cst_14 = arith.constant 1.000000e+00 : f32
    %28 = vector.broadcast %cst_14 : f32 to vector<2x32xf32>
    %29 = arith.addf %28, %27 : vector<2x32xf32>
    %30 = arith.divf %28, %29 : vector<2x32xf32>
    %31 = arith.mulf %30, %3 : vector<2x32xf32>
    %c0_15 = arith.constant 0 : index
    %c0_16 = arith.constant 0 : index
    %32 = vector.load %arg5[%c0_15, %c0_16] : memref<8x32xf32, #tpu.memory_space<vmem>>, vector<8x32xf32>
    %c0_17 = arith.constant 0 : index
    %c0_18 = arith.constant 0 : index
    %33 = vector.load %arg6[%c0_17, %c0_18] : memref<1x8xf32, #tpu.memory_space<vmem>>, vector<1x8xf32>
    %34 = vector.shape_cast %31 : vector<2x32xf32> to vector<2x1x32xf32>
    %35 = vector.shape_cast %32 : vector<8x32xf32> to vector<1x8x32xf32>
    %36 = vector.broadcast %34 : vector<2x1x32xf32> to vector<2x8x32xf32>
    %37 = vector.broadcast %35 : vector<1x8x32xf32> to vector<2x8x32xf32>
    %38 = arith.mulf %36, %37 : vector<2x8x32xf32>
    %cst_19 = arith.constant dense<0.000000e+00> : vector<2x8xf32>
    %39 = vector.multi_reduction <add>, %38, %cst_19 [2] : vector<2x8x32xf32> to vector<2x8xf32>
    %40 = vector.broadcast %33 : vector<1x8xf32> to vector<2x8xf32>
    %41 = arith.addf %39, %40 : vector<2x8xf32>
    %cst_20 = arith.constant 0.000000e+00 : f32
    %42 = vector.broadcast %cst_20 : f32 to vector<2x8xf32>
    %43 = arith.maximumf %41, %42 : vector<2x8xf32>
    %c0_21 = arith.constant 0 : index
    %c0_22 = arith.constant 0 : index
    %44 = vector.load %arg7[%c0_21, %c0_22] : memref<32x8xf32, #tpu.memory_space<vmem>>, vector<32x8xf32>
    %c0_23 = arith.constant 0 : index
    %c0_24 = arith.constant 0 : index
    %45 = vector.load %arg8[%c0_23, %c0_24] : memref<1x32xf32, #tpu.memory_space<vmem>>, vector<1x32xf32>
    %46 = vector.shape_cast %43 : vector<2x8xf32> to vector<2x1x8xf32>
    %47 = vector.shape_cast %44 : vector<32x8xf32> to vector<1x32x8xf32>
    %48 = vector.broadcast %46 : vector<2x1x8xf32> to vector<2x32x8xf32>
    %49 = vector.broadcast %47 : vector<1x32x8xf32> to vector<2x32x8xf32>
    %50 = arith.mulf %48, %49 : vector<2x32x8xf32>
    %cst_25 = arith.constant dense<0.000000e+00> : vector<2x32xf32>
    %51 = vector.multi_reduction <add>, %50, %cst_25 [2] : vector<2x32x8xf32> to vector<2x32xf32>
    %52 = vector.broadcast %45 : vector<1x32xf32> to vector<2x32xf32>
    %53 = arith.addf %51, %52 : vector<2x32xf32>
    %54 = arith.negf %53 : vector<2x32xf32>
    %55 = math.exp %54 : vector<2x32xf32>
    %cst_26 = arith.constant 1.000000e+00 : f32
    %56 = vector.broadcast %cst_26 : f32 to vector<2x32xf32>
    %57 = arith.addf %56, %55 : vector<2x32xf32>
    %58 = arith.divf %56, %57 : vector<2x32xf32>
    %59 = arith.mulf %30, %58 : vector<2x32xf32>
    %60 = vector.shape_cast %59 : vector<2x32xf32> to vector<2x32x1xf32>
    %61 = vector.broadcast %60 : vector<2x32x1xf32> to vector<2x32x256xf32>
    %62 = arith.mulf %0, %61 : vector<2x32x256xf32>
    %c0_27 = arith.constant 0 : index
    %c0_28 = arith.constant 0 : index
    %c0_29 = arith.constant 0 : index
    %63 = vector.load %arg9[%c0_27, %c0_28, %c0_29] : memref<2x32x256xf32, #tpu.memory_space<vmem>>, vector<2x32x256xf32>
    tpu.vector_store %arg9[%c0_27, %c0_28, %c0_29], %62 {strides = array<i32>} : memref<2x32x256xf32, #tpu.memory_space<vmem>>, vector<2x32x256xf32>,
    return
  }
}

</mosaic_0001>

<bundles_post_ra>
// kernel: tpu_custom_call.1
= control target key start
LH: loop header
LB: loop body
LE: loop exit
PB: predicated region body
PF: predicated region fallthrough
CT: control target
= control target key end

     0   :  { %14 = vsyncpa [#allocation3], 0  ;;  %s5317_s0 = inlined_call_operand.hbm [shape: f32[2,32,256], index: 0, kind: input, shape index: {}]   ;;  %s5318_s1 = inlined_call_operand.vmem [shape: f32[4,32], index: 1, kind: input, shape index: {}]   ;;  %s5319_s2 = inlined_call_operand.vmem [shape: f32[1,4], index: 2, kind: input, shape index: {}]   ;;  %s5320_s3 = inlined_call_operand.vmem [shape: f32[32,4], index: 3, kind: input, shape index: {}]   ;;  %s5321_s4 = inlined_call_operand.vmem [shape: f32[1,32], index: 4, kind: input, shape index: {}]   ;;  %s5322_s5 = inlined_call_operand.vmem [shape: f32[8,32], index: 5, kind: input, shape index: {}]   ;;  %s5323_s6 = inlined_call_operand.vmem [shape: f32[1,8], index: 6, kind: input, shape index: {}]   ;;  %s5324_s7 = inlined_call_operand.vmem [shape: f32[32,8], index: 7, kind: input, shape index: {}]   ;;  %s5325_s8 = inlined_call_operand.vmem [shape: f32[1,32], index: 8, kind: input, shape index: {}]   ;;  %s5326_s9 = inlined_call_operand.hbm [shape: f32[2,32,256], index: 9, kind: output, shape index: {}]  }
   0x1   :  { %15 = vsyncpa [#allocation4], 0  ;;  %s3672_s30 = smov [#allocation2]   ;;  %s3624_s13 = scalar_lea.hbm %s5317_s0, 2048 }
   0x2   :  { %s21_s10 = sshll.u32 %s3672_s30, 4  ;;  %p3625_p0 = scmp.ne.s32.totalorder %s5317_s0, %s3624_s13  ;;  %s22_s10 = int_to_ptr.vmem [resolvable:$true] %s21_s10 }
   0x3   :  { %p3628_p1 = scmp.lt.u32.totalorder %s3624_s13, %s5317_s0 }
   0x5   :  { %p3630_p2 = pnand %p3628_p1, %p3625_p0 }
   0x7   :  { %3633 = shalt.err (!%p3630_p2)
}
   0x8   :  { %s3634_s18 = scalar_lea.vmem %s22_s10, 2048  ;;  %p3639_p4 = scmp.lt.s32.totalorder %s22_s10, %s22_s10 }
   0x9   :  { %p3635_p3 = scmp.ne.s32.totalorder %s22_s10, %s3634_s18  ;;  %p3640_p5 = scmp.lt.s32.totalorder %s3634_s18, %s3634_s18 }
   0xb   :  { %p3641_p6 = por %p3640_p5, %p3639_p4 }
   0xd   :  { %p3642_p7 = pnand %p3641_p6, %p3635_p3 }
   0xf   :  { %3645 = shalt.err (!%p3642_p7)
}
  0x10   :  { %s3673_s19 = smov 256   ;;  %s3674_s20 = smov 16  }
  0x11   :  { %27 = dma.hbm_to_vmem [thread:$0]  %s5317_s0, 2048, %s22_s10, [#allocation3], %s3673_s19, %s3673_s19, %s3674_s20  }
  0x12   :  { %3668 = dma.done.wait [#allocation3], 2048  }
  0x13   :  { %3669 = vsyncadd [#allocation3], 4294965248  ;;  %v51_v0 = vld [vmem:[#allocation2 + $0x20] sm:$0xff]  ;;  %v52_v1 = vld [vmem:[#allocation2 + $0x28] sm:$0xff]  ;;  %v98_v24 = vlaneseq  ;;  %v3675_v30 = vmov 0   ;;  %vm361_vm0 = vcmask 130112  }
  0x14   :  { %v47_v2 = vld [vmem:[#allocation2] sm:$0xff]  ;;  %v69_v3 = vadd.f32 %v52_v1, %v51_v0  ;;  %v48_v4 = vld [vmem:[#allocation2 + $0x8] sm:$0xff]  ;;  %v53_v5 = vld [vmem:[#allocation2 + $0x30] sm:$0xff]  ;;  %3543 = vset.pattern.permute.xlu1 %v3675_v30  ;;  %3542 = vset.pattern.permute.xlu0 %v3675_v30  ;;  %vm368_vm1 = vcmask 195712   ;;  %vm375_vm2 = vcmask 261312   ;;  %vm510_vm3 = vcmask 1041409  }
  0x15   :  { %v54_v6 = vld [vmem:[#allocation2 + $0x38] sm:$0xff]  ;;  %v63_v7 = vadd.f32 %v48_v4, %v47_v2  ;;  %v49_v8 = vld [vmem:[#allocation2 + $0x10] sm:$0xff]  ;;  %v55_v14 = vld [vmem:[#allocation2 + $0x40] sm:$0xff]  ;;  %v3743_v25 = vshrl.u32 %v98_v24, 7  ;;  %vm512_vm4 = vcmask 1042434   ;;  %vm514_vm5 = vcmask 1043459  }
  0x16   :  { %v50_v9 = vld [vmem:[#allocation2 + $0x18] sm:$0xff]  ;;  %70 = vadd.xlane.f32.xlu1 %v69_v3  ;;  %v72_v10 = vadd.f32 %v54_v6, %v53_v5  ;;  %v57_v12 = vld [vmem:[#allocation2 + $0x50] sm:$0xff]  ;;  %v56_v15 = vld [vmem:[#allocation2 + $0x48] sm:$0xff]  ;;  %vm521_vm6 = vcmask 257024   ;;  %vm1385_vm7 = vcmask 1044484   ;;  %vm1387_vm8 = vcmask 1045509  }
  0x17   :  { %64 = vadd.xlane.f32.xlu0 %v63_v7  ;;  %v66_v11 = vadd.f32 %v50_v9, %v49_v8  ;;  %v58_v13 = vld [vmem:[#allocation2 + $0x58] sm:$0xff]  ;;  %v75_v17 = vadd.f32 %v56_v15, %v55_v14  ;;  %v61_v18 = vld [vmem:[#allocation2 + $0x70] sm:$0xff]  ;;  %v59_v20 = vld [vmem:[#allocation2 + $0x60] sm:$0xff]  ;;  %v3746_v26 = vsub.s32 0, %v3743_v25  ;;  %v3753_v29 = vsub.s32 1, %v3743_v25 }
  0x18   :  { %v78_v16 = vadd.f32 %v58_v13, %v57_v12  ;;  %v62_v19 = vld [vmem:[#allocation2 + $0x78] sm:$0xff]  ;;  %v60_v21 = vld [vmem:[#allocation2 + $0x68] sm:$0xff]  ;;  %v95_v27 = vld [vmem:[%s5318_s1] sm:$0xf]  ;;  %v3757_v32 = vsub.s32 2, %v3743_v25  ;;  %v3761_v34 = vsub.s32 3, %v3743_v25 }
  0x19   :  { %v84_v22 = vadd.f32 %v62_v19, %v61_v18  ;;  %v81_v23 = vadd.f32 %v60_v21, %v59_v20  ;;  %v101_v28 = vrot.slane %v95_v27, %v3746_v26  ;;  %v120_v31 = vrot.slane %v95_v27, %v3753_v29  ;;  %v3767_v36 = vld [vmem:[%s5320_s3] sm:$0xff] }
  0x1a   :  { %73 = vadd.xlane.f32.xlu1 %v72_v10  ;;  %v139_v33 = vrot.slane %v95_v27, %v3757_v32  ;;  %v158_v35 = vrot.slane %v95_v27, %v3761_v34  ;;  %v3517_v37 = vld [vmem:[%s5319_s2] ss:$0 sm:$0xff]  ;;  %v553_v38 = vrot.slane %v3767_v36, %v3746_v26  ;;  %v567_v39 = vrot.slane %v3767_v36, %v3757_v32 }
  0x1b   :  { %67 = vadd.xlane.f32.xlu0 %v66_v11  ;;  %v3777_v40 = vsub.s32 4, %v3743_v25  ;;  %v560_v41 = vrot.slane %v3767_v36, %v3753_v29  ;;  %v574_v43 = vrot.slane %v3767_v36, %v3761_v34  ;;  %v3786_v44 = vsub.s32 5, %v3743_v25 }
  0x1c   :  { %vm1389_vm9 = vcmask 1046534   ;;  %vm1391_vm10 = vcmask 1047559   ;;  %vm1450_vm11 = vcmask 31744   ;;  %vm2390_vm12 = vcmask 261120  }
  0x1d   :  { %v581_v42 = vrot.slane %v3767_v36, %v3777_v40  ;;  %v588_v45 = vrot.slane %v3767_v36, %v3786_v44  ;;  %vm3315_vm13 = vcmask 64512  }
  0x1e   :  { %79 = vadd.xlane.f32.xlu1 %v78_v16 }
  0x1f   :  { %76 = vadd.xlane.f32.xlu0 %v75_v17 }
  0x22   :  { %85 = vadd.xlane.f32.xlu1 %v84_v22 }
  0x23   :  { %82 = vadd.xlane.f32.xlu0 %v81_v23 }
  0x33   :  { %107 = vbcast.lane.b32.xlu1 %v101_v28, 264 }
  0x37   :  { %111 = vbcast.lane.b32.xlu1 %v101_v28, 272 }
  0x39   :  { %103 = vbcast.lane.b32.xlu0 %v101_v28, 256 }
  0x3b   :  { %115 = vbcast.lane.b32.xlu1 %v101_v28, 280 }
  0x3d   :  { %122 = vbcast.lane.b32.xlu0 %v120_v31, 256 }
  0x3f   :  { %126 = vbcast.lane.b32.xlu1 %v120_v31, 264 }
  0x41   :  { %130 = vbcast.lane.b32.xlu0 %v120_v31, 272 }
  0x43   :  { %134 = vbcast.lane.b32.xlu1 %v120_v31, 280 }
  0x45   :  { %141 = vbcast.lane.b32.xlu0 %v139_v33, 256 }
  0x47   :  { %145 = vbcast.lane.b32.xlu1 %v139_v33, 264 }
  0x49   :  { %149 = vbcast.lane.b32.xlu0 %v139_v33, 272 }
  0x4b   :  { %153 = vbcast.lane.b32.xlu1 %v139_v33, 280 }
  0x4d   :  { %160 = vbcast.lane.b32.xlu0 %v158_v35, 256 }
  0x4f   :  { %164 = vbcast.lane.b32.xlu1 %v158_v35, 264 }
  0x51   :  { %168 = vbcast.lane.b32.xlu0 %v158_v35, 272 }
  0x53   :  { %172 = vbcast.lane.b32.xlu1 %v158_v35, 280 }
  0x55   :  { %534 = vbcast.lane.b32.xlu0 %v3517_v37, 256 }
  0x57   :  { %555 = vbcast.lane.b32.xlu1 %v553_v38, 256 }
  0x59   :  { %569 = vbcast.lane.b32.xlu0 %v567_v39, 256 }
  0x5b   :  { %562 = vbcast.lane.b32.xlu1 %v560_v41, 256 }
  0x5d   :  { %583 = vbcast.lane.b32.xlu0 %v581_v42, 256 }
  0x5f   :  { %576 = vbcast.lane.b32.xlu1 %v574_v43, 256 }
  0x63   :  { %590 = vbcast.lane.b32.xlu1 %v588_v45, 256 }
  0xa3   :  { %v71_v46 = vpop.xlane.xlu1 %70 }
  0xa4   :  { %v65_v47 = vpop.xlane.xlu0 %64  ;;  %v3796_v60 = vmul.f32 0.00390625, %v71_v46 }
  0xa5   :  { %v3792_v55 = vmul.f32 0.00390625, %v65_v47 }
  0xa7   :  { %v74_v48 = vpop.xlane.xlu1 %73 }
  0xa8   :  { %v68_v49 = vpop.xlane.xlu0 %67  ;;  %v3799_v0 = vmul.f32 0.00390625, %v74_v48 }
  0xa9   :  { %v3790_v54 = vmul.f32 0.00390625, %v68_v49 }
  0xaa   :  { %5376 = vst [vmem:[#allocation8_spill] sm:$0xff] %v3799_v0 }
  0xab   :  { %v80_v50 = vpop.xlane.xlu1 %79 }
  0xac   :  { %v77_v51 = vpop.xlane.xlu0 %76  ;;  %v3817_v33 = vmul.f32 0.00390625, %v80_v50 }
  0xad   :  { %v3813_v27 = vmul.f32 0.00390625, %v77_v51 }
  0xae   :  { %5378 = vst [vmem:[#allocation10_spill] sm:$0xff] %v3817_v33 }
  0xaf   :  { %v86_v52 = vpop.xlane.xlu1 %85  ;;  %5377 = vst [vmem:[#allocation9_spill] sm:$0xff] %v3813_v27 }
  0xb0   :  { %v83_v53 = vpop.xlane.xlu0 %82  ;;  %v3823_v39 = vmul.f32 0.00390625, %v86_v52  ;;  %v3836_v52 = vsub.s32 7, %v3743_v25 }
  0xb1   :  { %v3819_v35 = vmul.f32 0.00390625, %v83_v53 }
  0xb2   :  { %5380 = vst [vmem:[#allocation12_spill] sm:$0xff] %v3823_v39 }
  0xb3   :  { %v108_v56 = vpop.permute.xlu1 %107  ;;  %5379 = vst [vmem:[#allocation11_spill] sm:$0xff] %v3819_v35 }
  0xb4   :  { %v191_v57 = vmul.f32 %v108_v56, %v3790_v54  ;;  %v104_v58 = vpop.permute.xlu0 %103  ;;  %v207_v37 = vmul.f32 %v108_v56, %v3817_v33 }
  0xb5   :  { %v190_v59 = vmul.f32 %v104_v58, %v3792_v55  ;;  %v206_v30 = vmul.f32 %v104_v58, %v3813_v27  ;;  %v3843_v58 = vsub.s32 6, %v3743_v25 }
  0xb6   :  { %258 = vperm.xlu1 %3543, %v191_v57   ;;  %v602_v57 = vrot.slane %v3767_v36, %v3836_v52 }
  0xb7   :  { %255 = vperm.xlu0 %3542, %v190_v59   ;;  %v112_v61 = vpop.permute.xlu1 %111  ;;  %v542_v59 = vld [vmem:[%s5320_s3 + $0x8] sm:$0xff] }
  0xb8   :  { %v192_v62 = vmul.f32 %v112_v61, %v3796_v60  ;;  %v123_v63 = vpop.permute.xlu0 %122  ;;  %v208_v38 = vmul.f32 %v112_v61, %v3819_v35 }
  0xb9   :  { %v194_v2 = vmul.f32 %v123_v63, %v3792_v55  ;;  %v210_v41 = vmul.f32 %v123_v63, %v3813_v27  ;;  %v595_v63 = vrot.slane %v3767_v36, %v3843_v58  ;;  %v543_v36 = vld [vmem:[%s5320_s3 + $0x10] sm:$0xff] }
  0xba   :  { %261 = vperm.xlu1 %3543, %v192_v62   ;;  %v616_v62 = vrot.slane %v542_v59, %v3753_v29 }
  0xbb   :  { %v116_v1 = vpop.permute.xlu1 %115 }
  0xbc   :  { %v193_v3 = vmul.f32 %v116_v1, %v3799_v0  ;;  %v131_v4 = vpop.permute.xlu0 %130  ;;  %v209_v42 = vmul.f32 %v116_v1, %v3823_v39  ;;  %v630_v1 = vrot.slane %v542_v59, %v3761_v34 }
  0xbd   :  { %v196_v6 = vmul.f32 %v131_v4, %v3796_v60  ;;  %v212_v43 = vmul.f32 %v131_v4, %v3819_v35  ;;  %v623_v4 = vrot.slane %v542_v59, %v3757_v32 }
  0xbe   :  { %264 = vperm.xlu0 %3542, %v193_v3   ;;  %267 = vperm.xlu1 %3543, %v194_v2   ;;  %v609_v2 = vrot.slane %v542_v59, %v3746_v26  ;;  %v644_v3 = vrot.slane %v542_v59, %v3786_v44 }
  0xbf   :  { %v127_v5 = vpop.permute.xlu1 %126 }
  0xc0   :  { %v195_v7 = vmul.f32 %v127_v5, %v3790_v54  ;;  %v142_v8 = vpop.permute.xlu0 %141  ;;  %v211_v45 = vmul.f32 %v127_v5, %v3817_v33  ;;  %v658_v5 = vrot.slane %v542_v59, %v3836_v52 }
  0xc1   :  { %v198_v10 = vmul.f32 %v142_v8, %v3792_v55  ;;  %v214_v46 = vmul.f32 %v142_v8, %v3813_v27  ;;  %v651_v8 = vrot.slane %v542_v59, %v3843_v58 }
  0xc2   :  { %270 = vperm.xlu0 %3542, %v195_v7   ;;  %273 = vperm.xlu1 %3543, %v196_v6   ;;  %v637_v6 = vrot.slane %v542_v59, %v3777_v40  ;;  %v672_v7 = vrot.slane %v543_v36, %v3753_v29 }
  0xc3   :  { %v135_v9 = vpop.permute.xlu1 %134 }
  0xc4   :  { %v197_v11 = vmul.f32 %v135_v9, %v3799_v0  ;;  %v150_v12 = vpop.permute.xlu0 %149  ;;  %v213_v47 = vmul.f32 %v135_v9, %v3823_v39  ;;  %v686_v9 = vrot.slane %v543_v36, %v3761_v34 }
  0xc5   :  { %v200_v14 = vmul.f32 %v150_v12, %v3796_v60  ;;  %v216_v48 = vmul.f32 %v150_v12, %v3819_v35  ;;  %v679_v12 = vrot.slane %v543_v36, %v3757_v32 }
  0xc6   :  { %276 = vperm.xlu0 %3542, %v197_v11   ;;  %279 = vperm.xlu1 %3543, %v198_v10   ;;  %v665_v10 = vrot.slane %v543_v36, %v3746_v26  ;;  %v700_v11 = vrot.slane %v543_v36, %v3786_v44 }
  0xc7   :  { %v146_v13 = vpop.permute.xlu1 %145 }
  0xc8   :  { %v199_v15 = vmul.f32 %v146_v13, %v3790_v54  ;;  %v161_v16 = vpop.permute.xlu0 %160  ;;  %v215_v49 = vmul.f32 %v146_v13, %v3817_v33  ;;  %v714_v13 = vrot.slane %v543_v36, %v3836_v52 }
  0xc9   :  { %v202_v18 = vmul.f32 %v161_v16, %v3792_v55  ;;  %v218_v50 = vmul.f32 %v161_v16, %v3813_v27 }
  0xca   :  { %282 = vperm.xlu0 %3542, %v199_v15   ;;  %285 = vperm.xlu1 %3543, %v200_v14   ;;  %v693_v14 = vrot.slane %v543_v36, %v3777_v40  ;;  %v544_v15 = vld [vmem:[%s5320_s3 + $0x18] sm:$0xff] }
  0xcb   :  { %v154_v17 = vpop.permute.xlu1 %153  ;;  %v728_v16 = vrot.slane %v544_v15, %v3753_v29 }
  0xcc   :  { %v201_v19 = vmul.f32 %v154_v17, %v3799_v0  ;;  %v169_v20 = vpop.permute.xlu0 %168  ;;  %v217_v51 = vmul.f32 %v154_v17, %v3823_v39  ;;  %v707_v17 = vrot.slane %v543_v36, %v3843_v58 }
  0xcd   :  { %v204_v22 = vmul.f32 %v169_v20, %v3796_v60  ;;  %v220_v53 = vmul.f32 %v169_v20, %v3819_v35  ;;  %v756_v20 = vrot.slane %v544_v15, %v3786_v44 }
  0xce   :  { %288 = vperm.xlu0 %3542, %v201_v19   ;;  %291 = vperm.xlu1 %3543, %v202_v18   ;;  %v742_v18 = vrot.slane %v544_v15, %v3761_v34  ;;  %v721_v19 = vrot.slane %v544_v15, %v3746_v26 }
  0xcf   :  { %v165_v21 = vpop.permute.xlu1 %164 }
  0xd0   :  { %v203_v23 = vmul.f32 %v165_v21, %v3790_v54  ;;  %v219_v56 = vmul.f32 %v165_v21, %v3817_v33  ;;  %v735_v21 = vrot.slane %v544_v15, %v3757_v32 }
  0xd2   :  { %294 = vperm.xlu0 %3542, %v203_v23   ;;  %297 = vperm.xlu1 %3543, %v204_v22   ;;  %v770_v23 = vrot.slane %v544_v15, %v3836_v52 }
  0xd3   :  { %v173_v28 = vpop.permute.xlu1 %172 }
  0xd4   :  { %v205_v31 = vmul.f32 %v173_v28, %v3799_v0  ;;  %v221_v61 = vmul.f32 %v173_v28, %v3823_v39  ;;  %v749_v28 = vrot.slane %v544_v15, %v3777_v40 }
  0xd6   :  { %300 = vperm.xlu0 %3542, %v205_v31   ;;  %303 = vperm.xlu1 %3543, %v206_v30   ;;  %v763_v31 = vrot.slane %v544_v15, %v3843_v58 }
  0xd7   :  { %v3878_v22 = vpop.permute.xlu1 %555 }
  0xda   :  { %306 = vperm.xlu0 %3542, %v207_v37   ;;  %309 = vperm.xlu1 %3543, %v208_v38   ;;  %v3885_v37 = vpop.permute.xlu0 %534  ;;  %v3518_v38 = vld [vmem:[%s5321_s4] ss:$0 sm:$0xff] }
  0xdb   :  { %v3882_v30 = vpop.permute.xlu1 %562 }
  0xde   :  { %312 = vperm.xlu0 %3542, %v209_v42   ;;  %315 = vperm.xlu1 %3543, %v210_v41   ;;  %v3892_v42 = vpop.permute.xlu0 %569 }
  0xdf   :  { %v3890_v41 = vpop.permute.xlu1 %576 }
  0xe2   :  { %318 = vperm.xlu0 %3542, %v211_v45   ;;  %321 = vperm.xlu1 %3543, %v212_v43   ;;  %v3897_v43 = vld [vmem:[%s5322_s5] sm:$0xff] }
  0xe3   :  { %v1569_v45 = vrot.slane %v3897_v43, %v3746_v26 }
  0xe6   :  { %324 = vperm.xlu0 %3542, %v213_v47   ;;  %327 = vperm.xlu1 %3543, %v214_v46   ;;  %v3901_v46 = vpop.permute.xlu1 %590  ;;  %v3903_v47 = vpop.permute.xlu0 %583 }
  0xea   :  { %330 = vperm.xlu0 %3542, %v215_v49   ;;  %333 = vperm.xlu1 %3543, %v216_v48   ;;  %v1588_v49 = vrot.slane %v3897_v43, %v3753_v29 }
  0xee   :  { %336 = vperm.xlu0 %3542, %v217_v51   ;;  %339 = vperm.xlu1 %3543, %v218_v50  }
  0xf2   :  { %342 = vperm.xlu0 %3542, %v219_v56   ;;  %345 = vperm.xlu1 %3543, %v220_v53  }
  0xf6   :  { %348 = vperm.xlu0 %3542, %v221_v61   ;;  %604 = vbcast.lane.b32.xlu1 %v602_v57, 256  ;;  %v1607_v57 = vrot.slane %v3897_v43, %v3757_v32 }
  0xfa   :  { %618 = vbcast.lane.b32.xlu1 %v616_v62, 256  ;;  %597 = vbcast.lane.b32.xlu0 %v595_v63, 256 }
  0xfe   :  { %632 = vbcast.lane.b32.xlu1 %v630_v1, 256  ;;  %611 = vbcast.lane.b32.xlu0 %v609_v2, 256  ;;  %v3919_v1 = vrot.slane %v3897_v43, %v3761_v34 }
 0x102   :  { %646 = vbcast.lane.b32.xlu1 %v644_v3, 256  ;;  %625 = vbcast.lane.b32.xlu0 %v623_v4, 256 }
 0x106   :  { %660 = vbcast.lane.b32.xlu1 %v658_v5, 256  ;;  %639 = vbcast.lane.b32.xlu0 %v637_v6, 256 }
 0x10a   :  { %674 = vbcast.lane.b32.xlu1 %v672_v7, 256  ;;  %653 = vbcast.lane.b32.xlu0 %v651_v8, 256  ;;  %v351_v7 = vand.u32 127, %v98_v24 }
 0x10c   :  { %v370_v15 = vadd.s32 4294967272, %v351_v7 }
 0x10e   :  { %688 = vbcast.lane.b32.xlu1 %v686_v9, 256  ;;  %667 = vbcast.lane.b32.xlu0 %v665_v10, 256  ;;  %v356_v10 = vadd.s32 4294967288, %v351_v7 }
 0x112   :  { %702 = vbcast.lane.b32.xlu1 %v700_v11, 256  ;;  %681 = vbcast.lane.b32.xlu0 %v679_v12, 256 }
 0x116   :  { %716 = vbcast.lane.b32.xlu1 %v714_v13, 256  ;;  %695 = vbcast.lane.b32.xlu0 %v693_v14, 256  ;;  %v363_v13 = vadd.s32 4294967280, %v351_v7  ;;  %v3931_v14 = vsub.s32 %v356_v10, %v3743_v25 }
 0x118   :  { %5381 = vst [vmem:[#allocation13_spill] sm:$0xff] %v3931_v14 }
 0x11a   :  { %730 = vbcast.lane.b32.xlu1 %v728_v16, 256  ;;  %709 = vbcast.lane.b32.xlu0 %v707_v17, 256  ;;  %v3934_v16 = vsub.s32 %v351_v7, %v3743_v25 }
 0x11e   :  { %744 = vbcast.lane.b32.xlu1 %v742_v18, 256  ;;  %723 = vbcast.lane.b32.xlu0 %v721_v19, 256  ;;  %v3940_v19 = vsub.s32 %v363_v13, %v3743_v25 }
 0x120   :  { %5382 = vst [vmem:[#allocation14_spill] sm:$0xff] %v3940_v19 }
 0x122   :  { %758 = vbcast.lane.b32.xlu1 %v756_v20, 256  ;;  %737 = vbcast.lane.b32.xlu0 %v735_v21, 256  ;;  %v3944_v21 = vsub.s32 %v370_v15, %v3743_v25 }
 0x124   :  { %5383 = vst [vmem:[#allocation15_spill] sm:$0xff] %v3944_v21 }
 0x126   :  { %772 = vbcast.lane.b32.xlu1 %v770_v23, 256  ;;  %751 = vbcast.lane.b32.xlu0 %v749_v28, 256 }
 0x12a   :  { %1485 = vbcast.lane.b32.xlu1 %v3518_v38, 264  ;;  %765 = vbcast.lane.b32.xlu0 %v763_v31, 256 }
 0x12e   :  { %1489 = vbcast.lane.b32.xlu1 %v3518_v38, 272  ;;  %1481 = vbcast.lane.b32.xlu0 %v3518_v38, 256 }
 0x132   :  { %1493 = vbcast.lane.b32.xlu1 %v3518_v38, 280  ;;  %1571 = vbcast.lane.b32.xlu0 %v1569_v45, 256 }
 0x135   :  { %v3905_v48 = vpop.permute.xlu1 %258 }
 0x136   :  { %1575 = vbcast.lane.b32.xlu1 %v1569_v45, 264  ;;  %1579 = vbcast.lane.b32.xlu0 %v1569_v45, 272  ;;  %v3909_v50 = vpop.permute.xlu0 %255  ;;  %v360_v31 = vrot.slane %v3905_v48, %v3931_v14 }
 0x137   :  { %v355_v38 = vrot.slane %v3909_v50, %v3934_v16 }
 0x139   :  { %v3911_v51 = vpop.permute.xlu1 %261  ;;  %v362_v10 = vsel %vm361_vm0, %v360_v31, %v355_v38 }
 0x13a   :  { %1583 = vbcast.lane.b32.xlu1 %v1569_v45, 280  ;;  %1590 = vbcast.lane.b32.xlu0 %v1588_v49, 256  ;;  %v367_v48 = vrot.slane %v3911_v51, %v3940_v19 }
 0x13d   :  { %v268_v53 = vpop.permute.xlu1 %267  ;;  %v3913_v56 = vpop.permute.xlu0 %264 }
 0x13e   :  { %1594 = vbcast.lane.b32.xlu1 %v1588_v49, 264  ;;  %1598 = vbcast.lane.b32.xlu0 %v1588_v49, 272  ;;  %v380_v23 = vrot.slane %v268_v53, %v3934_v16 }
 0x141   :  { %v274_v59 = vpop.permute.xlu1 %273  ;;  %v271_v61 = vpop.permute.xlu0 %270 }
 0x142   :  { %1602 = vbcast.lane.b32.xlu1 %v1588_v49, 280  ;;  %1609 = vbcast.lane.b32.xlu0 %v1607_v57, 256  ;;  %v384_v17 = vrot.slane %v271_v61, %v3931_v14  ;;  %v389_v45 = vrot.slane %v274_v59, %v3940_v19 }
 0x145   :  { %v280_v62 = vpop.permute.xlu1 %279  ;;  %v277_v63 = vpop.permute.xlu0 %276 }
 0x146   :  { %1613 = vbcast.lane.b32.xlu1 %v1607_v57, 264  ;;  %1617 = vbcast.lane.b32.xlu0 %v1607_v57, 272  ;;  %v399_v49 = vrot.slane %v280_v62, %v3934_v16  ;;  %v394_v25 = vrot.slane %v277_v63, %v3944_v21  ;;  %v374_v62 = vrot.slane %v3913_v56, %v3944_v21 }
 0x149   :  { %v286_v2 = vpop.permute.xlu1 %285  ;;  %v283_v3 = vpop.permute.xlu0 %282 }
 0x14a   :  { %1621 = vbcast.lane.b32.xlu1 %v1607_v57, 280  ;;  %1628 = vbcast.lane.b32.xlu0 %v3919_v1, 256  ;;  %v403_v20 = vrot.slane %v283_v3, %v3931_v14  ;;  %v385_v57 = vsel %vm361_vm0, %v384_v17, %v380_v23  ;;  %v408_v61 = vrot.slane %v286_v2, %v3940_v19 }
 0x14c   :  { %v404_v7 = vsel %vm361_vm0, %v403_v20, %v399_v49 }
 0x14d   :  { %v292_v4 = vpop.permute.xlu1 %291  ;;  %v289_v5 = vpop.permute.xlu0 %288  ;;  %v409_v13 = vsel %vm368_vm1, %v408_v61, %v404_v7 }
 0x14e   :  { %1636 = vbcast.lane.b32.xlu0 %v3919_v1, 272  ;;  %v418_v53 = vrot.slane %v292_v4, %v3934_v16  ;;  %v413_v50 = vrot.slane %v289_v5, %v3944_v21  ;;  %v390_v4 = vsel %vm368_vm1, %v389_v45, %v385_v57 }
 0x14f   :  { %v395_v51 = vsel %vm375_vm2, %v394_v25, %v390_v4 }
 0x150   :  { %v414_v56 = vsel %vm375_vm2, %v413_v50, %v409_v13 }
 0x151   :  { %v298_v6 = vpop.permute.xlu1 %297  ;;  %v295_v36 = vpop.permute.xlu0 %294 }
 0x152   :  { %v422_v28 = vrot.slane %v295_v36, %v3931_v14  ;;  %v427_v59 = vrot.slane %v298_v6, %v3940_v19  ;;  %v369_v6 = vsel %vm368_vm1, %v367_v48, %v362_v10 }
 0x154   :  { %v423_v63 = vsel %vm361_vm0, %v422_v28, %v418_v53 }
 0x155   :  { %v3924_v8 = vpop.permute.xlu1 %303  ;;  %v301_v9 = vpop.permute.xlu0 %300  ;;  %v428_v17 = vsel %vm368_vm1, %v427_v59, %v423_v63 }
 0x156   :  { %v432_v2 = vrot.slane %v301_v9, %v3944_v21  ;;  %v376_v9 = vsel %vm375_vm2, %v374_v62, %v369_v6  ;;  %v437_v62 = vrot.slane %v3924_v8, %v3934_v16 }
 0x157   :  { %v511_v23 = vsel %vm510_vm3, %v395_v51, %v376_v9 }
 0x158   :  { %v433_v20 = vsel %vm375_vm2, %v432_v2, %v428_v17  ;;  %v513_v38 = vsel %vm512_vm4, %v414_v56, %v511_v23 }
 0x159   :  { %v3926_v11 = vpop.permute.xlu1 %309  ;;  %v3928_v12 = vpop.permute.xlu0 %306  ;;  %v515_v45 = vsel %vm514_vm5, %v433_v20, %v513_v38 }
 0x15a   :  { %v522_v53 = vsel %vm521_vm6, %v515_v45, 0.0  ;;  %v441_v48 = vrot.slane %v3928_v12, %v3931_v14  ;;  %v446_v4 = vrot.slane %v3926_v11, %v3940_v19 }
 0x15c   :  { %v442_v51 = vsel %vm361_vm0, %v441_v48, %v437_v62 }
 0x15d   :  { %v316_v18 = vpop.permute.xlu1 %315  ;;  %v3937_v24 = vpop.permute.xlu0 %312  ;;  %v447_v9 = vsel %vm368_vm1, %v446_v4, %v442_v51 }
 0x15e   :  { %v456_v7 = vrot.slane %v316_v18, %v3934_v16  ;;  %v451_v8 = vrot.slane %v3937_v24, %v3944_v21 }
 0x160   :  { %v452_v24 = vsel %vm375_vm2, %v451_v8, %v447_v9 }
 0x161   :  { %v322_v3 = vpop.permute.xlu1 %321  ;;  %v319_v36 = vpop.permute.xlu0 %318 }
 0x162   :  { %v460_v49 = vrot.slane %v319_v36, %v3931_v14  ;;  %v465_v50 = vrot.slane %v322_v3, %v3940_v19 }
 0x164   :  { %v461_v36 = vsel %vm361_vm0, %v460_v49, %v456_v7  ;;  %v1645_v7 = vrot.slane %v3897_v43, %v3777_v40 }
 0x165   :  { %v328_v5 = vpop.permute.xlu1 %327  ;;  %v325_v15 = vpop.permute.xlu0 %324 }
 0x166   :  { %v475_v59 = vrot.slane %v328_v5, %v3934_v16  ;;  %v470_v63 = vrot.slane %v325_v15, %v3944_v21  ;;  %v466_v15 = vsel %vm368_vm1, %v465_v50, %v461_v36 }
 0x168   :  { %v471_v11 = vsel %vm375_vm2, %v470_v63, %v466_v15 }
 0x169   :  { %v334_v28 = vpop.permute.xlu1 %333  ;;  %v331_v31 = vpop.permute.xlu0 %330  ;;  %v516_v38 = vsel %vm510_vm3, %v471_v11, %v452_v24 }
 0x16a   :  { %v479_v57 = vrot.slane %v331_v31, %v3931_v14  ;;  %v484_v2 = vrot.slane %v334_v28, %v3940_v19 }
 0x16c   :  { %v480_v12 = vsel %vm361_vm0, %v479_v57, %v475_v59  ;;  %v4030_v59 = vrot.slane %v3897_v43, %v3786_v44 }
 0x16d   :  { %v340_v25 = vpop.permute.xlu1 %339  ;;  %v337_v61 = vpop.permute.xlu0 %336  ;;  %v485_v56 = vsel %vm368_vm1, %v484_v2, %v480_v12 }
 0x16e   :  { %523 = vadd.xlane.f32.xlu1 %v522_v53  ;;  %v489_v18 = vrot.slane %v337_v61, %v3944_v21  ;;  %v494_v13 = vrot.slane %v340_v25, %v3934_v16 }
 0x170   :  { %v490_v20 = vsel %vm375_vm2, %v489_v18, %v485_v56 }
 0x171   :  { %v346_v10 = vpop.permute.xlu1 %345  ;;  %v343_v3 = vpop.permute.xlu0 %342  ;;  %v517_v49 = vsel %vm512_vm4, %v490_v20, %v516_v38 }
 0x172   :  { %v498_v5 = vrot.slane %v343_v3, %v3931_v14  ;;  %v503_v6 = vrot.slane %v346_v10, %v3940_v19 }
 0x174   :  { %v499_v17 = vsel %vm361_vm0, %v498_v5, %v494_v13 }
 0x175   :  { %v349_v23 = vpop.permute.xlu0 %348  ;;  %v504_v31 = vsel %vm368_vm1, %v503_v6, %v499_v17  ;;  %v4014_v57 = vpop.permute.xlu1 %604 }
 0x176   :  { %v508_v28 = vrot.slane %v349_v23, %v3944_v21 }
 0x178   :  { %v509_v45 = vsel %vm375_vm2, %v508_v28, %v504_v31 }
 0x179   :  { %v518_v25 = vsel %vm514_vm5, %v509_v45, %v517_v49  ;;  %v4018_v53 = vpop.permute.xlu1 %618  ;;  %v4047_v12 = vpop.permute.xlu0 %597 }
 0x17a   :  { %v525_v61 = vsel %vm521_vm6, %v518_v25, 0.0 }
 0x17b   :  { %526 = vadd.xlane.f32.xlu0 %v525_v61 }
 0x17d   :  { %v4022_v48 = vpop.permute.xlu1 %632  ;;  %v4051_v10 = vpop.permute.xlu0 %611 }
 0x17f   :  { %1632 = vbcast.lane.b32.xlu1 %v3919_v1, 264 }
 0x181   :  { %v4026_v50 = vpop.permute.xlu1 %646  ;;  %v4055_v51 = vpop.permute.xlu0 %625 }
 0x183   :  { %1640 = vbcast.lane.b32.xlu1 %v3919_v1, 280 }
 0x185   :  { %v4033_v62 = vpop.permute.xlu1 %660  ;;  %v4059_v13 = vpop.permute.xlu0 %639 }
 0x187   :  { %1651 = vbcast.lane.b32.xlu1 %v1645_v7, 264 }
 0x189   :  { %v4035_v1 = vpop.permute.xlu1 %674  ;;  %v4063_v15 = vpop.permute.xlu0 %653 }
 0x18b   :  { %1659 = vbcast.lane.b32.xlu1 %v1645_v7, 280 }
 0x18d   :  { %v4038_v36 = vpop.permute.xlu1 %688  ;;  %v4067_v11 = vpop.permute.xlu0 %667 }
 0x18f   :  { %1670 = vbcast.lane.b32.xlu1 %v4030_v59, 264 }
 0x191   :  { %1647 = vbcast.lane.b32.xlu0 %v1645_v7, 256  ;;  %v4041_v63 = vpop.permute.xlu1 %702  ;;  %v4071_v17 = vpop.permute.xlu0 %681 }
 0x195   :  { %1655 = vbcast.lane.b32.xlu0 %v1645_v7, 272  ;;  %v4043_v2 = vpop.permute.xlu1 %716  ;;  %v4075_v20 = vpop.permute.xlu0 %695 }
 0x199   :  { %1666 = vbcast.lane.b32.xlu0 %v4030_v59, 256  ;;  %v4045_v4 = vpop.permute.xlu1 %730  ;;  %v4079_v24 = vpop.permute.xlu0 %709 }
 0x19d   :  { %1674 = vbcast.lane.b32.xlu0 %v4030_v59, 272  ;;  %v4049_v18 = vpop.permute.xlu1 %744  ;;  %v4083_v31 = vpop.permute.xlu0 %723 }
 0x1a1   :  { %v4053_v3 = vpop.permute.xlu1 %758  ;;  %v4087_v45 = vpop.permute.xlu0 %737 }
 0x1a5   :  { %v4057_v8 = vpop.permute.xlu1 %772  ;;  %v4091_v25 = vpop.permute.xlu0 %751 }
 0x1a9   :  { %v4061_v5 = vpop.permute.xlu1 %1485  ;;  %v4095_v7 = vpop.permute.xlu0 %765 }
 0x1ad   :  { %v4065_v6 = vpop.permute.xlu1 %1489  ;;  %v4104_v35 = vpop.permute.xlu0 %1481 }
 0x1b1   :  { %v4069_v56 = vpop.permute.xlu1 %1493 }
 0x1b5   :  { %v4073_v9 = vpop.permute.xlu1 %1575 }
 0x1b6   :  { %5384 = vst [vmem:[#allocation16_spill] sm:$0xff] %v4073_v9 }
 0x1b9   :  { %v4077_v23 = vpop.permute.xlu1 %1583 }
 0x1ba   :  { %5385 = vst [vmem:[#allocation17_spill] sm:$0xff] %v4077_v23 }
 0x1bd   :  { %v4081_v28 = vpop.permute.xlu1 %1594 }
 0x1be   :  { %5386 = vst [vmem:[#allocation18_spill] sm:$0xff] %v4081_v28 }
 0x1c1   :  { %v4085_v38 = vpop.permute.xlu1 %1602 }
 0x1c2   :  { %5387 = vst [vmem:[#allocation19_spill] sm:$0xff] %v4085_v38 }
 0x1c5   :  { %v4089_v49 = vpop.permute.xlu1 %1613 }
 0x1c6   :  { %5388 = vst [vmem:[#allocation20_spill] sm:$0xff] %v4089_v49 }
 0x1c9   :  { %v4093_v61 = vpop.permute.xlu1 %1621 }
 0x1ca   :  { %5389 = vst [vmem:[#allocation21_spill] sm:$0xff] %v4093_v61 }
 0x1fb   :  { %v524_v21 = vpop.xlane.xlu1 %523 }
 0x1fc   :  { %v537_v19 = vadd.f32 %v3885_v37, %v524_v21  ;;  %v4110_v21 = vpop.permute.xlu0 %1571 }
 0x1fe   :  { %v4098_v14 = vmax.f32 %v537_v19, 0.0 }
 0x200   :  { %v806_v39 = vmul.f32 %v3878_v22, %v4098_v14  ;;  %v807_v33 = vmul.f32 %v3882_v30, %v4098_v14  ;;  %v809_v27 = vmul.f32 %v3890_v41, %v4098_v14  ;;  %v808_v61 = vmul.f32 %v3892_v42, %v4098_v14 }
 0x201   :  { %v811_v19 = vmul.f32 %v3901_v46, %v4098_v14  ;;  %v810_v49 = vmul.f32 %v3903_v47, %v4098_v14  ;;  %v812_v38 = vmul.f32 %v4047_v12, %v4098_v14  ;;  %v818_v23 = vmul.f32 %v4059_v13, %v4098_v14 }
 0x202   :  { %938 = vperm.xlu1 %3543, %v807_v33   ;;  %935 = vperm.xlu0 %3542, %v806_v39   ;;  %v813_v33 = vmul.f32 %v4014_v57, %v4098_v14  ;;  %v4118_v39 = vpop.permute.xlu0 %1579  ;;  %v834_v0 = vmul.f32 %v4091_v25, %v4098_v14 }
 0x206   :  { %944 = vperm.xlu1 %3543, %v809_v27   ;;  %941 = vperm.xlu0 %3542, %v808_v61   ;;  %v815_v27 = vmul.f32 %v4018_v53, %v4098_v14  ;;  %v814_v61 = vmul.f32 %v4051_v10, %v4098_v14  ;;  %v4126_v28 = vpop.permute.xlu0 %1590 }
 0x20a   :  { %950 = vperm.xlu1 %3543, %v811_v19   ;;  %947 = vperm.xlu0 %3542, %v810_v49   ;;  %v817_v49 = vmul.f32 %v4022_v48, %v4098_v14  ;;  %v816_v19 = vmul.f32 %v4055_v51, %v4098_v14 }
 0x20e   :  { %956 = vperm.xlu1 %3543, %v813_v33   ;;  %953 = vperm.xlu0 %3542, %v812_v38   ;;  %v819_v38 = vmul.f32 %v4026_v50, %v4098_v14  ;;  %v4134_v33 = vpop.permute.xlu0 %1598 }
 0x20f   :  { %5390 = vst [vmem:[#allocation22_spill] sm:$0xff] %v4134_v33  ;;  %v824_v33 = vmul.f32 %v4071_v17, %v4098_v14 }
 0x212   :  { %962 = vperm.xlu1 %3543, %v815_v27   ;;  %959 = vperm.xlu0 %3542, %v814_v61   ;;  %v821_v27 = vmul.f32 %v4033_v62, %v4098_v14  ;;  %v820_v61 = vmul.f32 %v4063_v15, %v4098_v14  ;;  %v4142_v9 = vpop.permute.xlu0 %1609 }
 0x213   :  { %5391 = vst [vmem:[#allocation23_spill] sm:$0xff] %v4142_v9 }
 0x216   :  { %968 = vperm.xlu1 %3543, %v817_v49   ;;  %965 = vperm.xlu0 %3542, %v816_v19   ;;  %v823_v49 = vmul.f32 %v4035_v1, %v4098_v14  ;;  %v822_v19 = vmul.f32 %v4067_v11, %v4098_v14 }
 0x21a   :  { %974 = vperm.xlu1 %3543, %v819_v38   ;;  %971 = vperm.xlu0 %3542, %v818_v23   ;;  %v825_v23 = vmul.f32 %v4038_v36, %v4098_v14  ;;  %v4150_v38 = vpop.permute.xlu0 %1617 }
 0x21b   :  { %5392 = vst [vmem:[#allocation24_spill] sm:$0xff] %v4150_v38 }
 0x21e   :  { %980 = vperm.xlu1 %3543, %v821_v27   ;;  %977 = vperm.xlu0 %3542, %v820_v61   ;;  %v827_v27 = vmul.f32 %v4041_v63, %v4098_v14  ;;  %v826_v61 = vmul.f32 %v4075_v20, %v4098_v14  ;;  %v4158_v9 = vpop.permute.xlu0 %1628 }
 0x21f   :  { %5393 = vst [vmem:[#allocation25_spill] sm:$0xff] %v4158_v9 }
 0x222   :  { %986 = vperm.xlu1 %3543, %v823_v49   ;;  %983 = vperm.xlu0 %3542, %v822_v19   ;;  %v829_v49 = vmul.f32 %v4043_v2, %v4098_v14  ;;  %v828_v19 = vmul.f32 %v4079_v24, %v4098_v14  ;;  %v4168_v38 = vpop.permute.xlu0 %1636 }
 0x223   :  { %5394 = vst [vmem:[#allocation26_spill] sm:$0xff] %v4168_v38  ;;  %v836_v38 = vmul.f32 %v4095_v7, %v4098_v14 }
 0x226   :  { %992 = vperm.xlu1 %3543, %v825_v23   ;;  %989 = vperm.xlu0 %3542, %v824_v33   ;;  %v831_v33 = vmul.f32 %v4045_v4, %v4098_v14  ;;  %v830_v23 = vmul.f32 %v4083_v31, %v4098_v14  ;;  %v527_v9 = vpop.xlane.xlu0 %526 }
 0x22a   :  { %998 = vperm.xlu1 %3543, %v827_v27   ;;  %995 = vperm.xlu0 %3542, %v826_v61   ;;  %v833_v27 = vmul.f32 %v4049_v18, %v4098_v14  ;;  %v832_v61 = vmul.f32 %v4087_v45, %v4098_v14 }
 0x22e   :  { %1004 = vperm.xlu1 %3543, %v829_v49   ;;  %1001 = vperm.xlu0 %3542, %v828_v19   ;;  %v835_v49 = vmul.f32 %v4053_v3, %v4098_v14  ;;  %v538_v19 = vadd.f32 %v3885_v37, %v527_v9 }
 0x232   :  { %1010 = vperm.xlu1 %3543, %v831_v33   ;;  %1007 = vperm.xlu0 %3542, %v830_v23   ;;  %v837_v33 = vmul.f32 %v4057_v8, %v4098_v14  ;;  %v4181_v23 = vmax.f32 %v538_v19, 0.0 }
 0x234   :  { %v838_v37 = vmul.f32 %v3878_v22, %v4181_v23  ;;  %v840_v9 = vmul.f32 %v3892_v42, %v4181_v23  ;;  %v843_v14 = vmul.f32 %v3901_v46, %v4181_v23  ;;  %v845_v22 = vmul.f32 %v4014_v57, %v4181_v23 }
 0x235   :  { %v846_v42 = vmul.f32 %v4051_v10, %v4181_v23  ;;  %v849_v46 = vmul.f32 %v4022_v48, %v4181_v23  ;;  %v851_v57 = vmul.f32 %v4026_v50, %v4181_v23  ;;  %v852_v10 = vmul.f32 %v4063_v15, %v4181_v23 }
 0x236   :  { %1016 = vperm.xlu1 %3543, %v833_v27   ;;  %1013 = vperm.xlu0 %3542, %v832_v61   ;;  %v839_v27 = vmul.f32 %v3882_v30, %v4181_v23  ;;  %v844_v30 = vmul.f32 %v4047_v12, %v4181_v23  ;;  %v850_v12 = vmul.f32 %v4059_v13, %v4181_v23  ;;  %v4235_v61 = vpop.permute.xlu0 %1647 }
 0x237   :  { %v855_v48 = vmul.f32 %v4035_v1, %v4181_v23  ;;  %v857_v50 = vmul.f32 %v4038_v36, %v4181_v23  ;;  %v856_v13 = vmul.f32 %v4071_v17, %v4181_v23  ;;  %v859_v15 = vmul.f32 %v4041_v63, %v4181_v23  ;;  %5397 = vst [vmem:[#allocation29_spill] sm:$0xff] %v4235_v61 }
 0x238   :  { %v858_v1 = vmul.f32 %v4075_v20, %v4181_v23  ;;  %v861_v36 = vmul.f32 %v4043_v2, %v4181_v23  ;;  %v860_v17 = vmul.f32 %v4079_v24, %v4181_v23  ;;  %v863_v63 = vmul.f32 %v4045_v4, %v4181_v23 }
 0x239   :  { %v862_v20 = vmul.f32 %v4083_v31, %v4181_v23  ;;  %v865_v2 = vmul.f32 %v4049_v18, %v4181_v23  ;;  %v864_v24 = vmul.f32 %v4087_v45, %v4181_v23  ;;  %v867_v4 = vmul.f32 %v4053_v3, %v4181_v23 }
 0x23a   :  { %1022 = vperm.xlu1 %3543, %v835_v49   ;;  %1019 = vperm.xlu0 %3542, %v834_v0   ;;  %v841_v0 = vmul.f32 %v3890_v41, %v4181_v23  ;;  %v847_v41 = vmul.f32 %v4018_v53, %v4181_v23  ;;  %v853_v53 = vmul.f32 %v4033_v62, %v4181_v23  ;;  %v4225_v62 = vpop.permute.xlu1 %1632  ;;  %v4245_v19 = vpop.permute.xlu0 %1655 }
 0x23b   :  { %5395 = vst [vmem:[#allocation27_spill] sm:$0xff] %v4225_v62  ;;  %5399 = vst [vmem:[#allocation31_spill] sm:$0xff] %v4245_v19  ;;  %v869_v18 = vmul.f32 %v4057_v8, %v4181_v23  ;;  %v868_v45 = vmul.f32 %v4095_v7, %v4181_v23  ;;  %v1683_v3 = vrot.slane %v3897_v43, %v3843_v58 }
 0x23c   :  { %v1702_v7 = vrot.slane %v3897_v43, %v3836_v52  ;;  %v3527_v43 = vld [vmem:[%s5323_s6] ss:$0 sm:$0xff] }
 0x23e   :  { %1028 = vperm.xlu1 %3543, %v837_v33   ;;  %1025 = vperm.xlu0 %3542, %v836_v38   ;;  %v842_v38 = vmul.f32 %v3903_v47, %v4181_v23  ;;  %v848_v47 = vmul.f32 %v4055_v51, %v4181_v23  ;;  %v854_v51 = vmul.f32 %v4067_v11, %v4181_v23  ;;  %v4231_v11 = vpop.permute.xlu1 %1640  ;;  %v4255_v31 = vpop.permute.xlu0 %1666 }
 0x23f   :  { %5396 = vst [vmem:[#allocation28_spill] sm:$0xff] %v4231_v11  ;;  %5401 = vst [vmem:[#allocation33_spill] sm:$0xff] %v4255_v31 }
 0x242   :  { %1034 = vperm.xlu1 %3543, %v839_v27   ;;  %1031 = vperm.xlu0 %3542, %v838_v37   ;;  %v4243_v49 = vpop.permute.xlu1 %1651  ;;  %v866_v27 = vmul.f32 %v4091_v25, %v4181_v23 }
 0x243   :  { %5398 = vst [vmem:[#allocation30_spill] sm:$0xff] %v4243_v49  ;;  %v4375_v49 = vld [vmem:[%s5324_s7 + $0x18] sm:$0xff] }
 0x244   :  { %v2590_v31 = vrot.slane %v4375_v49, %v3746_v26  ;;  %v2604_v11 = vrot.slane %v4375_v49, %v3757_v32  ;;  %v2611_v19 = vrot.slane %v4375_v49, %v3761_v34 }
 0x246   :  { %1040 = vperm.xlu1 %3543, %v841_v0   ;;  %1037 = vperm.xlu0 %3542, %v840_v9   ;;  %v4251_v33 = vpop.permute.xlu1 %1659  ;;  %v4265_v0 = vpop.permute.xlu0 %1674 }
 0x247   :  { %5400 = vst [vmem:[#allocation32_spill] sm:$0xff] %v4251_v33  ;;  %5403 = vst [vmem:[#allocation35_spill] sm:$0xff] %v4265_v0 }
 0x24a   :  { %1046 = vperm.xlu1 %3543, %v843_v14   ;;  %1043 = vperm.xlu0 %3542, %v842_v38   ;;  %v4263_v37 = vpop.permute.xlu1 %1670 }
 0x24b   :  { %5402 = vst [vmem:[#allocation34_spill] sm:$0xff] %v4263_v37 }
 0x24e   :  { %1052 = vperm.xlu1 %3543, %v845_v22   ;;  %1049 = vperm.xlu0 %3542, %v844_v30  }
 0x252   :  { %1058 = vperm.xlu1 %3543, %v847_v41   ;;  %1055 = vperm.xlu0 %3542, %v846_v42  }
 0x256   :  { %1064 = vperm.xlu1 %3543, %v849_v46   ;;  %1061 = vperm.xlu0 %3542, %v848_v47  }
 0x25a   :  { %1070 = vperm.xlu1 %3543, %v851_v57   ;;  %1067 = vperm.xlu0 %3542, %v850_v12  }
 0x25e   :  { %1076 = vperm.xlu1 %3543, %v853_v53   ;;  %1073 = vperm.xlu0 %3542, %v852_v10  }
 0x262   :  { %1082 = vperm.xlu1 %3543, %v855_v48   ;;  %1079 = vperm.xlu0 %3542, %v854_v51  }
 0x266   :  { %1088 = vperm.xlu1 %3543, %v857_v50   ;;  %1085 = vperm.xlu0 %3542, %v856_v13  }
 0x26a   :  { %1094 = vperm.xlu1 %3543, %v859_v15   ;;  %1091 = vperm.xlu0 %3542, %v858_v1  }
 0x26e   :  { %1100 = vperm.xlu1 %3543, %v861_v36   ;;  %1097 = vperm.xlu0 %3542, %v860_v17  }
 0x272   :  { %1106 = vperm.xlu1 %3543, %v863_v63   ;;  %1103 = vperm.xlu0 %3542, %v862_v20   ;;  %v2411_v63 = vld [vmem:[%s5324_s7 + $0x8] sm:$0xff] }
 0x276   :  { %1112 = vperm.xlu1 %3543, %v865_v2   ;;  %1109 = vperm.xlu0 %3542, %v864_v24   ;;  %v2478_v24 = vrot.slane %v2411_v63, %v3746_v26 }
 0x27a   :  { %1118 = vperm.xlu1 %3543, %v867_v4   ;;  %1115 = vperm.xlu0 %3542, %v866_v27   ;;  %v2485_v4 = vrot.slane %v2411_v63, %v3753_v29 }
 0x27e   :  { %1124 = vperm.xlu1 %3543, %v869_v18   ;;  %1121 = vperm.xlu0 %3542, %v868_v45   ;;  %v2492_v45 = vrot.slane %v2411_v63, %v3757_v32 }
 0x281   :  { %v4269_v9 = vpop.permute.xlu1 %938  ;;  %v4271_v25 = vpop.permute.xlu0 %935 }
 0x282   :  { %1678 = vbcast.lane.b32.xlu1 %v4030_v59, 280  ;;  %1685 = vbcast.lane.b32.xlu0 %v1683_v3, 256  ;;  %v2410_v59 = vld [vmem:[%s5324_s7] sm:$0xff] }
 0x283   :  { %v2422_v46 = vrot.slane %v2410_v59, %v3746_v26  ;;  %v2429_v47 = vrot.slane %v2410_v59, %v3753_v29  ;;  %v2436_v53 = vrot.slane %v2410_v59, %v3757_v32  ;;  %v2443_v10 = vrot.slane %v2410_v59, %v3761_v34 }
 0x284   :  { %v2450_v50 = vrot.slane %v2410_v59, %v3777_v40  ;;  %v2457_v13 = vrot.slane %v2410_v59, %v3786_v44  ;;  %v2464_v36 = vrot.slane %v2410_v59, %v3843_v58  ;;  %v2471_v17 = vrot.slane %v2410_v59, %v3836_v52 }
 0x285   :  { %v4274_v8 = vpop.permute.xlu1 %944  ;;  %v4276_v14 = vpop.permute.xlu0 %941 }
 0x286   :  { %1689 = vbcast.lane.b32.xlu1 %v1683_v3, 264  ;;  %1693 = vbcast.lane.b32.xlu0 %v1683_v3, 272 }
 0x289   :  { %v4280_v23 = vpop.permute.xlu1 %950  ;;  %v4282_v38 = vpop.permute.xlu0 %947 }
 0x28a   :  { %1697 = vbcast.lane.b32.xlu1 %v1683_v3, 280  ;;  %1704 = vbcast.lane.b32.xlu0 %v1702_v7, 256  ;;  %v2499_v3 = vrot.slane %v2411_v63, %v3761_v34 }
 0x28d   :  { %v4284_v22 = vpop.permute.xlu1 %956  ;;  %v4286_v30 = vpop.permute.xlu0 %953 }
 0x28e   :  { %1708 = vbcast.lane.b32.xlu1 %v1702_v7, 264  ;;  %1712 = vbcast.lane.b32.xlu0 %v1702_v7, 272 }
 0x291   :  { %v4294_v41 = vpop.permute.xlu1 %962  ;;  %v4296_v42 = vpop.permute.xlu0 %959 }
 0x292   :  { %1716 = vbcast.lane.b32.xlu1 %v1702_v7, 280  ;;  %2403 = vbcast.lane.b32.xlu0 %v3527_v43, 256  ;;  %v2506_v43 = vrot.slane %v2411_v63, %v3777_v40 }
 0x295   :  { %v4300_v57 = vpop.permute.xlu1 %968  ;;  %v4302_v12 = vpop.permute.xlu0 %965 }
 0x296   :  { %2424 = vbcast.lane.b32.xlu1 %v2422_v46, 256  ;;  %2431 = vbcast.lane.b32.xlu0 %v2429_v47, 256  ;;  %v2513_v46 = vrot.slane %v2411_v63, %v3786_v44 }
 0x299   :  { %v4306_v48 = vpop.permute.xlu1 %974  ;;  %v4308_v51 = vpop.permute.xlu0 %971 }
 0x29a   :  { %2438 = vbcast.lane.b32.xlu1 %v2436_v53, 256  ;;  %2445 = vbcast.lane.b32.xlu0 %v2443_v10, 256  ;;  %v2520_v10 = vrot.slane %v2411_v63, %v3843_v58 }
 0x29d   :  { %v4312_v15 = vpop.permute.xlu1 %980  ;;  %v4314_v1 = vpop.permute.xlu0 %977 }
 0x29e   :  { %2452 = vbcast.lane.b32.xlu1 %v2450_v50, 256  ;;  %2459 = vbcast.lane.b32.xlu0 %v2457_v13, 256  ;;  %v2527_v50 = vrot.slane %v2411_v63, %v3836_v52  ;;  %v2412_v13 = vld [vmem:[%s5324_s7 + $0x10] sm:$0xff] }
 0x29f   :  { %v2548_v63 = vrot.slane %v2412_v13, %v3757_v32  ;;  %v1137_v32 = vrot.slane %v4276_v14, %v3934_v16  ;;  %v1149_v14 = vrot.slane %v4280_v23, %v3934_v16 }
 0x2a1   :  { %v4321_v20 = vpop.permute.xlu1 %986  ;;  %v4323_v2 = vpop.permute.xlu0 %983 }
 0x2a2   :  { %2466 = vbcast.lane.b32.xlu1 %v2464_v36, 256  ;;  %2473 = vbcast.lane.b32.xlu0 %v2471_v17, 256  ;;  %v1197_v23 = vrot.slane %v4321_v20, %v3934_v16 }
 0x2a5   :  { %v4327_v27 = vpop.permute.xlu1 %992  ;;  %v4329_v18 = vpop.permute.xlu0 %989 }
 0x2a6   :  { %2480 = vbcast.lane.b32.xlu1 %v2478_v24, 256  ;;  %2487 = vbcast.lane.b32.xlu0 %v2485_v4, 256  ;;  %v2534_v24 = vrot.slane %v2412_v13, %v3746_v26  ;;  %v2541_v4 = vrot.slane %v2412_v13, %v3753_v29  ;;  %v2618_v26 = vrot.slane %v4375_v49, %v3777_v40 }
 0x2a9   :  { %v4333_v7 = vpop.permute.xlu1 %998  ;;  %v4335_v59 = vpop.permute.xlu0 %995 }
 0x2aa   :  { %2494 = vbcast.lane.b32.xlu1 %v2492_v45, 256  ;;  %2501 = vbcast.lane.b32.xlu0 %v2499_v3, 256 }
 0x2ad   :  { %v4339_v47 = vpop.permute.xlu1 %1004  ;;  %v4341_v53 = vpop.permute.xlu0 %1001 }
 0x2ae   :  { %2508 = vbcast.lane.b32.xlu1 %v2506_v43, 256  ;;  %2515 = vbcast.lane.b32.xlu0 %v2513_v46, 256  ;;  %v2555_v43 = vrot.slane %v2412_v13, %v3761_v34 }
 0x2b1   :  { %v4348_v36 = vpop.permute.xlu1 %1010  ;;  %v4350_v17 = vpop.permute.xlu0 %1007 }
 0x2b2   :  { %2522 = vbcast.lane.b32.xlu1 %v2520_v10, 256  ;;  %2529 = vbcast.lane.b32.xlu0 %v2527_v50, 256  ;;  %v2562_v10 = vrot.slane %v2412_v13, %v3777_v40  ;;  %v2569_v50 = vrot.slane %v2412_v13, %v3786_v44  ;;  %v1141_v40 = vrot.slane %v4274_v8, %v3934_v16 }
 0x2b3   :  { %v1153_v8 = vrot.slane %v4286_v30, %v3934_v16  ;;  %v1169_v30 = vrot.slane %v4302_v12, %v3934_v16 }
 0x2b5   :  { %v4354_v45 = vpop.permute.xlu1 %1016  ;;  %v4356_v3 = vpop.permute.xlu0 %1013 }
 0x2b6   :  { %2536 = vbcast.lane.b32.xlu1 %v2534_v24, 256  ;;  %2543 = vbcast.lane.b32.xlu0 %v2541_v4, 256  ;;  %v2576_v24 = vrot.slane %v2412_v13, %v3843_v58  ;;  %v2583_v4 = vrot.slane %v2412_v13, %v3836_v52 }
 0x2b9   :  { %v4360_v46 = vpop.permute.xlu1 %1022  ;;  %v4362_v37 = vpop.permute.xlu0 %1019 }
 0x2ba   :  { %2550 = vbcast.lane.b32.xlu1 %v2548_v63, 256  ;;  %2557 = vbcast.lane.b32.xlu0 %v2555_v43, 256 }
 0x2bd   :  { %v4366_v33 = vpop.permute.xlu1 %1028  ;;  %v4368_v0 = vpop.permute.xlu0 %1025 }
 0x2be   :  { %2564 = vbcast.lane.b32.xlu1 %v2562_v10, 256  ;;  %2571 = vbcast.lane.b32.xlu0 %v2569_v50, 256  ;;  %v2597_v10 = vrot.slane %v4375_v49, %v3753_v29  ;;  %v1133_v29 = vrot.slane %v4269_v9, %v3934_v16  ;;  %v1145_v9 = vrot.slane %v4282_v38, %v3934_v16 }
 0x2bf   :  { %v1165_v38 = vrot.slane %v4294_v41, %v3934_v16  ;;  %v1157_v41 = vrot.slane %v4284_v22, %v3934_v16 }
 0x2c1   :  { %v4377_v63 = vpop.permute.xlu1 %1034  ;;  %v4379_v43 = vpop.permute.xlu0 %1031 }
 0x2c2   :  { %2578 = vbcast.lane.b32.xlu1 %v2576_v24, 256  ;;  %2585 = vbcast.lane.b32.xlu0 %v2583_v4, 256 }
 0x2c5   :  { %v4385_v50 = vpop.permute.xlu1 %1040  ;;  %v4387_v13 = vpop.permute.xlu0 %1037 }
 0x2c6   :  { %2592 = vbcast.lane.b32.xlu1 %v2590_v31, 256  ;;  %2599 = vbcast.lane.b32.xlu0 %v2597_v10, 256  ;;  %v1129_v31 = vrot.slane %v4271_v25, %v3934_v16 }
 0x2c9   :  { %v4393_v24 = vpop.permute.xlu1 %1046  ;;  %v4395_v62 = vpop.permute.xlu0 %1043 }
 0x2ca   :  { %2606 = vbcast.lane.b32.xlu1 %v2604_v11, 256  ;;  %2613 = vbcast.lane.b32.xlu0 %v2611_v19, 256  ;;  %v1382_v11 = vsel %vm510_vm3, %v1133_v29, %v1129_v31 }
 0x2cb   :  { %v1383_v19 = vsel %vm512_vm4, %v1137_v32, %v1382_v11  ;;  %v1161_v32 = vrot.slane %v4296_v42, %v3934_v16  ;;  %v1193_v11 = vrot.slane %v4323_v2, %v3934_v16 }
 0x2cd   :  { %v4405_v4 = vpop.permute.xlu1 %1052  ;;  %v4407_v34 = vpop.permute.xlu0 %1049  ;;  %v1393_v2 = vsel %vm510_vm3, %v1165_v38, %v1161_v32  ;;  %v1400_v12 = vsel %vm510_vm3, %v1197_v23, %v1193_v11  ;;  %v1225_v38 = vrot.slane %v4350_v17, %v3934_v16  ;;  %v1233_v32 = vrot.slane %v4356_v3, %v3934_v16 }
 0x2ce   :  { %2620 = vbcast.lane.b32.xlu1 %v2618_v26, 256  ;;  %v1384_v26 = vsel %vm514_vm5, %v1141_v40, %v1383_v19  ;;  %v1201_v19 = vrot.slane %v4329_v18, %v3934_v16  ;;  %v1205_v18 = vrot.slane %v4327_v27, %v3934_v16  ;;  %v1394_v22 = vsel %vm512_vm4, %v1169_v30, %v1393_v2 }
 0x2cf   :  { %v1386_v29 = vsel %vm1385_vm7, %v1145_v9, %v1384_v26  ;;  %v1173_v26 = vrot.slane %v4300_v57, %v3934_v16  ;;  %v1229_v57 = vrot.slane %v4348_v36, %v3934_v16  ;;  %v1217_v3 = vrot.slane %v4341_v53, %v3934_v16 }
 0x2d0   :  { %v1388_v9 = vsel %vm1387_vm8, %v1149_v14, %v1386_v29  ;;  %v1177_v14 = vrot.slane %v4308_v51, %v3934_v16  ;;  %v1401_v29 = vsel %vm512_vm4, %v1201_v19, %v1400_v12  ;;  %v1181_v51 = vrot.slane %v4306_v48, %v3934_v16 }
 0x2d1   :  { %v4415_v10 = vpop.permute.xlu1 %1058  ;;  %v4417_v25 = vpop.permute.xlu0 %1055  ;;  %v1390_v20 = vsel %vm1389_vm9, %v1153_v8, %v1388_v9  ;;  %v1209_v8 = vrot.slane %v4335_v59, %v3934_v16  ;;  %v1395_v11 = vsel %vm514_vm5, %v1173_v26, %v1394_v22  ;;  %v1213_v59 = vrot.slane %v4333_v7, %v3934_v16 }
 0x2d2   :  { %v1392_v27 = vsel %vm1391_vm10, %v1157_v41, %v1390_v20  ;;  %v1402_v36 = vsel %vm514_vm5, %v1205_v18, %v1401_v29  ;;  %v1396_v17 = vsel %vm1385_vm7, %v1177_v14, %v1395_v11  ;;  %v1407_v48 = vsel %vm510_vm3, %v1229_v57, %v1225_v38 }
 0x2d3   :  { %v1403_v19 = vsel %vm1385_vm7, %v1209_v8, %v1402_v36  ;;  %v1451_v41 = vsel %vm1450_vm11, %v1392_v27, 0.0  ;;  %v1237_v9 = vrot.slane %v4354_v45, %v3934_v16  ;;  %v1261_v7 = vrot.slane %v4377_v63, %v3934_v16 }
 0x2d4   :  { %v1257_v20 = vrot.slane %v4379_v43, %v3934_v16  ;;  %v1189_v2 = vrot.slane %v4312_v15, %v3934_v16  ;;  %v1408_v26 = vsel %vm512_vm4, %v1233_v32, %v1407_v48  ;;  %v1241_v53 = vrot.slane %v4362_v37, %v3934_v16 }
 0x2d5   :  { %v4425_v31 = vpop.permute.xlu1 %1064  ;;  %v4435_v40 = vpop.permute.xlu0 %1061  ;;  %v1265_v12 = vrot.slane %v4387_v13, %v3934_v16  ;;  %v1293_v45 = vrot.slane %v4415_v10, %v3934_v16  ;;  %v1289_v63 = vrot.slane %v4417_v25, %v3934_v16  ;;  %v1404_v43 = vsel %vm1387_vm8, %v1213_v59, %v1403_v19 }
 0x2d6   :  { %v1397_v15 = vsel %vm1387_vm8, %v1181_v51, %v1396_v17  ;;  %v1185_v14 = vrot.slane %v4314_v1, %v3934_v16  ;;  %v1221_v37 = vrot.slane %v4339_v47, %v3934_v16  ;;  %v1297_v13 = vrot.slane %v4435_v40, %v3934_v16 }
 0x2d7   :  { %v1405_v29 = vsel %vm1389_vm9, %v1217_v3, %v1404_v43  ;;  %v1245_v10 = vrot.slane %v4360_v46, %v3934_v16  ;;  %v1409_v25 = vsel %vm514_vm5, %v1237_v9, %v1408_v26  ;;  %v1414_v8 = vsel %vm510_vm3, %v1261_v7, %v1257_v20 }
 0x2d8   :  { %v1269_v57 = vrot.slane %v4385_v50, %v3934_v16  ;;  %v1410_v1 = vsel %vm1385_vm7, %v1241_v53, %v1409_v25  ;;  %v1249_v47 = vrot.slane %v4368_v0, %v3934_v16  ;;  %v1415_v38 = vsel %vm512_vm4, %v1265_v12, %v1414_v8 }
 0x2d9   :  { %v4444_v42 = vpop.permute.xlu1 %1070  ;;  %v4453_v61 = vpop.permute.xlu0 %1067  ;;  %v1273_v40 = vrot.slane %v4395_v62, %v3934_v16  ;;  %v1421_v46 = vsel %vm510_vm3, %v1293_v45, %v1289_v63  ;;  %v1301_v32 = vrot.slane %v4425_v31, %v3934_v16  ;;  %v1398_v62 = vsel %vm1389_vm9, %v1185_v14, %v1397_v15 }
 0x2da   :  { %v1422_v59 = vsel %vm512_vm4, %v1297_v13, %v1421_v46  ;;  %v1305_v0 = vrot.slane %v4453_v61, %v3934_v16  ;;  %v1277_v17 = vrot.slane %v4393_v24, %v3934_v16  ;;  %v1416_v19 = vsel %vm514_vm5, %v1269_v57, %v1415_v38 }
 0x2db   :  { %v1406_v31 = vsel %vm1391_vm10, %v1221_v37, %v1405_v29  ;;  %v1411_v3 = vsel %vm1387_vm8, %v1245_v10, %v1410_v1  ;;  %v1253_v48 = vrot.slane %v4366_v33, %v3934_v16  ;;  %v1417_v9 = vsel %vm1385_vm7, %v1273_v40, %v1416_v19 }
 0x2dc   :  { %v1281_v61 = vrot.slane %v4407_v34, %v3934_v16  ;;  %v1412_v20 = vsel %vm1389_vm9, %v1249_v47, %v1411_v3  ;;  %v1309_v24 = vrot.slane %v4444_v42, %v3934_v16  ;;  %v1423_v26 = vsel %vm514_vm5, %v1301_v32, %v1422_v59 }
 0x2dd   :  { %v4468_v23 = vpop.permute.xlu1 %1076  ;;  %v4476_v30 = vpop.permute.xlu0 %1073  ;;  %v1424_v33 = vsel %vm1385_vm7, %v1305_v0, %v1423_v26  ;;  %v1418_v42 = vsel %vm1387_vm8, %v1277_v17, %v1417_v9  ;;  %v1285_v43 = vrot.slane %v4405_v4, %v3934_v16  ;;  %v1413_v14 = vsel %vm1391_vm10, %v1253_v48, %v1412_v20 }
 0x2de   :  { %v1313_v45 = vrot.slane %v4476_v30, %v3934_v16  ;;  %v1419_v37 = vsel %vm1389_vm9, %v1281_v61, %v1418_v42  ;;  %v1317_v30 = vrot.slane %v4468_v23, %v3934_v16  ;;  %v1425_v10 = vsel %vm1387_vm8, %v1309_v24, %v1424_v33 }
 0x2df   :  { %v1460_v1 = vsel %vm1450_vm11, %v1413_v14, 0.0  ;;  %v1420_v23 = vsel %vm1391_vm10, %v1285_v43, %v1419_v37  ;;  %v2625_v37 = vrot.slane %v4375_v49, %v3786_v44 }
 0x2e0   :  { %v1426_v8 = vsel %vm1389_vm9, %v1313_v45, %v1425_v10  ;;  %v1463_v59 = vsel %vm1450_vm11, %v1420_v23, 0.0 }
 0x2e1   :  { %v1083_v18 = vpop.permute.xlu1 %1082  ;;  %v1080_v22 = vpop.permute.xlu0 %1079 }
 0x2e2   :  { %v1325_v51 = vrot.slane %v1083_v18, %v3934_v16  ;;  %v1321_v50 = vrot.slane %v1080_v22, %v3934_v16  ;;  %v1399_v22 = vsel %vm1391_vm10, %v1189_v2, %v1398_v62 }
 0x2e3   :  { %v1454_v47 = vsel %vm1450_vm11, %v1399_v22, 0.0 }
 0x2e4   :  { %v1428_v53 = vsel %vm510_vm3, %v1325_v51, %v1321_v50 }
 0x2e5   :  { %v1089_v27 = vpop.permute.xlu1 %1088  ;;  %v1086_v11 = vpop.permute.xlu0 %1085 }
 0x2e6   :  { %v1329_v36 = vrot.slane %v1086_v11, %v3934_v16  ;;  %v1333_v12 = vrot.slane %v1089_v27, %v3934_v16  ;;  %v1427_v27 = vsel %vm1391_vm10, %v1317_v30, %v1426_v8 }
 0x2e7   :  { %v1466_v0 = vsel %vm1450_vm11, %v1427_v27, 0.0 }
 0x2e8   :  { %v1429_v34 = vsel %vm512_vm4, %v1329_v36, %v1428_v53 }
 0x2e9   :  { %v1095_v7 = vpop.permute.xlu1 %1094  ;;  %1452 = vadd.xlane.f32.xlu0 %v1451_v41  ;;  %v1092_v18 = vpop.permute.xlu0 %1091  ;;  %v1457_v41 = vsel %vm1450_vm11, %v1406_v31, 0.0  ;;  %v1430_v29 = vsel %vm514_vm5, %v1333_v12, %v1429_v34 }
 0x2ea   :  { %v1337_v63 = vrot.slane %v1092_v18, %v3934_v16  ;;  %v1341_v13 = vrot.slane %v1095_v7, %v3934_v16 }
 0x2ec   :  { %v1431_v4 = vsel %vm1385_vm7, %v1337_v63, %v1430_v29 }
 0x2ed   :  { %v1101_v15 = vpop.permute.xlu1 %1100  ;;  %1458 = vadd.xlane.f32.xlu0 %v1457_v41  ;;  %v1098_v2 = vpop.permute.xlu0 %1097  ;;  %v1432_v46 = vsel %vm1387_vm8, %v1341_v13, %v1431_v4  ;;  %v2639_v13 = vrot.slane %v4375_v49, %v3836_v52 }
 0x2ee   :  { %v1345_v25 = vrot.slane %v1098_v2, %v3934_v16  ;;  %v1349_v38 = vrot.slane %v1101_v15, %v3934_v16 }
 0x2f0   :  { %v1433_v32 = vsel %vm1389_vm9, %v1345_v25, %v1432_v46  ;;  %v2632_v25 = vrot.slane %v4375_v49, %v3843_v58 }
 0x2f1   :  { %v1107_v57 = vpop.permute.xlu1 %1106  ;;  %1461 = vadd.xlane.f32.xlu0 %v1460_v1  ;;  %v1104_v40 = vpop.permute.xlu0 %1103  ;;  %v1434_v62 = vsel %vm1391_vm10, %v1349_v38, %v1433_v32 }
 0x2f2   :  { %1455 = vadd.xlane.f32.xlu1 %v1454_v47  ;;  %v1357_v51 = vrot.slane %v1107_v57, %v3934_v16  ;;  %v1353_v50 = vrot.slane %v1104_v40, %v3934_v16  ;;  %v1469_v9 = vsel %vm1450_vm11, %v1434_v62, 0.0 }
 0x2f4   :  { %v1435_v19 = vsel %vm510_vm3, %v1357_v51, %v1353_v50 }
 0x2f5   :  { %v1113_v11 = vpop.permute.xlu1 %1112  ;;  %1464 = vadd.xlane.f32.xlu0 %v1463_v59  ;;  %v1110_v36 = vpop.permute.xlu0 %1109 }
 0x2f6   :  { %1467 = vadd.xlane.f32.xlu1 %v1466_v0  ;;  %v1361_v17 = vrot.slane %v1110_v36, %v3934_v16  ;;  %v1365_v31 = vrot.slane %v1113_v11, %v3934_v16 }
 0x2f8   :  { %v1436_v3 = vsel %vm512_vm4, %v1361_v17, %v1435_v19 }
 0x2f9   :  { %v1119_v48 = vpop.permute.xlu1 %1118  ;;  %1470 = vadd.xlane.f32.xlu0 %v1469_v9  ;;  %v1116_v61 = vpop.permute.xlu0 %1115  ;;  %v1437_v24 = vsel %vm514_vm5, %v1365_v31, %v1436_v3 }
 0x2fa   :  { %v1369_v7 = vrot.slane %v1116_v61, %v3934_v16  ;;  %v1373_v20 = vrot.slane %v1119_v48, %v3934_v16 }
 0x2fc   :  { %v1438_v26 = vsel %vm1385_vm7, %v1369_v7, %v1437_v24 }
 0x2fd   :  { %v1125_v53 = vpop.permute.xlu1 %1124  ;;  %v1122_v18 = vpop.permute.xlu0 %1121  ;;  %v1439_v45 = vsel %vm1387_vm8, %v1373_v20, %v1438_v26 }
 0x2fe   :  { %v1381_v12 = vrot.slane %v1125_v53, %v3934_v16  ;;  %v1377_v33 = vrot.slane %v1122_v18, %v3934_v16 }
 0x300   :  { %v1440_v34 = vsel %vm1389_vm9, %v1377_v33, %v1439_v45 }
 0x301   :  { %v1441_v63 = vsel %vm1391_vm10, %v1381_v12, %v1440_v34  ;;  %v4595_v42 = vpop.permute.xlu0 %1685  ;;  %v4597_v43 = vpop.permute.xlu1 %1678 }
 0x302   :  { %v1472_v22 = vsel %vm1450_vm11, %v1441_v63, 0.0 }
 0x303   :  { %1473 = vadd.xlane.f32.xlu1 %v1472_v22 }
 0x305   :  { %v4599_v15 = vpop.permute.xlu0 %1693  ;;  %v4601_v41 = vpop.permute.xlu1 %1689 }
 0x309   :  { %v4603_v14 = vpop.permute.xlu0 %1704  ;;  %v4607_v30 = vpop.permute.xlu1 %1697 }
 0x30d   :  { %v4611_v29 = vpop.permute.xlu0 %1712  ;;  %v4613_v2 = vpop.permute.xlu1 %1708 }
 0x30f   :  { %2627 = vbcast.lane.b32.xlu0 %v2625_v37, 256 }
 0x311   :  { %v4615_v10 = vpop.permute.xlu0 %2403  ;;  %v4617_v4 = vpop.permute.xlu1 %1716 }
 0x313   :  { %2641 = vbcast.lane.b32.xlu0 %v2639_v13, 256 }
 0x314   :  { %2634 = vbcast.lane.b32.xlu1 %v2632_v25, 256 }
 0x315   :  { %v4621_v44 = vpop.permute.xlu0 %2431  ;;  %v4623_v8 = vpop.permute.xlu1 %2424 }
 0x319   :  { %v4625_v57 = vpop.permute.xlu0 %2445  ;;  %v4627_v52 = vpop.permute.xlu1 %2438 }
 0x31d   :  { %v4629_v1 = vpop.permute.xlu0 %2459  ;;  %v4631_v47 = vpop.permute.xlu1 %2452 }
 0x321   :  { %v4633_v23 = vpop.permute.xlu0 %2473  ;;  %v4635_v38 = vpop.permute.xlu1 %2466 }
 0x325   :  { %v4637_v40 = vpop.permute.xlu0 %2487  ;;  %v4639_v58 = vpop.permute.xlu1 %2480 }
 0x329   :  { %v4641_v49 = vpop.permute.xlu0 %2501  ;;  %v4643_v27 = vpop.permute.xlu1 %2494 }
 0x32d   :  { %v4645_v46 = vpop.permute.xlu0 %2515  ;;  %v4647_v32 = vpop.permute.xlu1 %2508 }
 0x331   :  { %v4649_v51 = vpop.permute.xlu0 %2529  ;;  %v4651_v50 = vpop.permute.xlu1 %2522 }
 0x332   :  { %5404 = vst [vmem:[#allocation36_spill] sm:$0xff] %v4651_v50 }
 0x335   :  { %v4653_v11 = vpop.permute.xlu0 %2543  ;;  %v4655_v59 = vpop.permute.xlu1 %2536 }
 0x336   :  { %5405 = vst [vmem:[#allocation37_spill] sm:$0xff] %v4653_v11  ;;  %5406 = vst [vmem:[#allocation38_spill] sm:$0xff] %v4655_v59 }
 0x339   :  { %v4657_v0 = vpop.permute.xlu0 %2557  ;;  %v4659_v36 = vpop.permute.xlu1 %2550 }
 0x33a   :  { %5407 = vst [vmem:[#allocation39_spill] sm:$0xff] %v4657_v0  ;;  %5408 = vst [vmem:[#allocation40_spill] sm:$0xff] %v4659_v36  ;;  %v5438_v0 = vld [vmem:[#allocation33_spill] sm:$0xff] }
 0x33d   :  { %v4661_v62 = vpop.permute.xlu0 %2571  ;;  %v4663_v17 = vpop.permute.xlu1 %2564 }
 0x33e   :  { %5409 = vst [vmem:[#allocation41_spill] sm:$0xff] %v4661_v62  ;;  %5410 = vst [vmem:[#allocation42_spill] sm:$0xff] %v4663_v17 }
 0x341   :  { %v4665_v19 = vpop.permute.xlu0 %2585  ;;  %v4667_v31 = vpop.permute.xlu1 %2578 }
 0x342   :  { %5411 = vst [vmem:[#allocation43_spill] sm:$0xff] %v4665_v19  ;;  %5412 = vst [vmem:[#allocation44_spill] sm:$0xff] %v4667_v31 }
 0x345   :  { %v4669_v3 = vpop.permute.xlu0 %2599  ;;  %v4671_v48 = vpop.permute.xlu1 %2592 }
 0x346   :  { %5413 = vst [vmem:[#allocation45_spill] sm:$0xff] %v4669_v3  ;;  %5414 = vst [vmem:[#allocation46_spill] sm:$0xff] %v4671_v48  ;;  %v5432_v48 = vld [vmem:[#allocation26_spill] sm:$0xff] }
 0x349   :  { %v4673_v9 = vpop.permute.xlu0 %2613  ;;  %v4675_v61 = vpop.permute.xlu1 %2606 }
 0x34a   :  { %5415 = vst [vmem:[#allocation47_spill] sm:$0xff] %v4673_v9  ;;  %5416 = vst [vmem:[#allocation48_spill] sm:$0xff] %v4675_v61  ;;  %v5431_v61 = vld [vmem:[#allocation20_spill] sm:$0xff] }
 0x34d   :  { %v4678_v26 = vpop.permute.xlu1 %2620 }
 0x34e   :  { %5417 = vst [vmem:[#allocation49_spill] sm:$0xff] %v4678_v26 }
 0x376   :  { %v1453_v7 = vpop.xlane.xlu0 %1452 }
 0x377   :  { %v1499_v20 = vadd.f32 %v4104_v35, %v1453_v7 }
 0x379   :  { %v3519_v24 = vmul.f32 -1.442695, %v1499_v20 }
 0x37a   :  { %v1459_v53 = vpop.xlane.xlu0 %1458 }
 0x37b   :  { %3544 = vpow2.f32 %v3519_v24  ;;  %v1501_v12 = vadd.f32 %v4065_v6, %v1459_v53 }
 0x37d   :  { %v3521_v18 = vmul.f32 -1.442695, %v1501_v12 }
 0x37e   :  { %v1462_v33 = vpop.xlane.xlu0 %1461 }
 0x37f   :  { %v1456_v45 = vpop.xlane.xlu1 %1455  ;;  %3546 = vpow2.f32 %v3521_v18  ;;  %v1502_v34 = vadd.f32 %v4069_v56, %v1462_v33 }
 0x380   :  { %v1500_v63 = vadd.f32 %v4061_v5, %v1456_v45 }
 0x381   :  { %v3522_v22 = vmul.f32 -1.442695, %v1502_v34 }
 0x382   :  { %v3520_v37 = vmul.f32 -1.442695, %v1500_v63 }
 0x383   :  { %3548 = vpow2.f32 %v3522_v22 }
 0x384   :  { %3550 = vpow2.f32 %v3520_v37 }
 0x385   :  { %v3545_v13 = vpop.eup %3544 }
 0x386   :  { %v1531_v25 = vadd.f32 1.0, %v3545_v13 }
 0x388   :  { %3552 = vrcp.f32 %v1531_v25  ;;  %v5422_v25 = vld [vmem:[#allocation8_spill] sm:$0xff] }
 0x389   :  { %v3547_v7 = vpop.eup %3546 }
 0x38a   :  { %v1533_v20 = vadd.f32 1.0, %v3547_v7  ;;  %v5423_v7 = vld [vmem:[#allocation16_spill] sm:$0xff] }
 0x38c   :  { %3554 = vrcp.f32 %v1533_v20 }
 0x38d   :  { %v3549_v24 = vpop.eup %3548 }
 0x38e   :  { %v3551_v53 = vpop.eup %3550  ;;  %v1534_v12 = vadd.f32 1.0, %v3549_v24  ;;  %v5424_v24 = vld [vmem:[#allocation22_spill] sm:$0xff] }
 0x38f   :  { %v1532_v19 = vadd.f32 1.0, %v3551_v53 }
 0x390   :  { %3556 = vrcp.f32 %v1534_v12  ;;  %v5425_v12 = vld [vmem:[#allocation17_spill] sm:$0xff] }
 0x391   :  { %3558 = vrcp.f32 %v1532_v19 }
 0x392   :  { %v4683_v18 = vpop.eup %3552 }
 0x393   :  { %5418 = vst [vmem:[#allocation50_spill] sm:$0xff] %v4683_v18  ;;  %v4687_v33 = vmul.f32 %v4683_v18, %v3792_v55 }
 0x395   :  { %v1750_v45 = vmul.f32 %v4110_v21, %v4687_v33  ;;  %v1754_v13 = vmul.f32 %v4126_v28, %v4687_v33  ;;  %v1770_v59 = vmul.f32 %v5438_v0, %v4687_v33 }
 0x396   :  { %v4691_v34 = vpop.eup %3554 }
 0x397   :  { %5419 = vst [vmem:[#allocation51_spill] sm:$0xff] %v4691_v34  ;;  %v4695_v63 = vmul.f32 %v4691_v34, %v3796_v60  ;;  %1879 = vperm.xlu0 %3542, %v1750_v45   ;;  %v5429_v34 = vld [vmem:[#allocation19_spill] sm:$0xff] }
 0x399   :  { %v1752_v22 = vmul.f32 %v4118_v39, %v4695_v63  ;;  %v1756_v53 = vmul.f32 %v5424_v24, %v4695_v63  ;;  %v1764_v17 = vmul.f32 %v5432_v48, %v4695_v63 }
 0x39a   :  { %v4699_v19 = vpop.eup %3556 }
 0x39b   :  { %5420 = vst [vmem:[#allocation52_spill] sm:$0xff] %v4699_v19  ;;  %v4701_v37 = vpop.eup %3558  ;;  %1885 = vperm.xlu0 %3542, %v1752_v22   ;;  %v4711_v60 = vmul.f32 %v4699_v19, %v5422_v25  ;;  %v5427_v25 = vld [vmem:[#allocation18_spill] sm:$0xff] }
 0x39c   :  { %5421 = vst [vmem:[#allocation53_spill] sm:$0xff] %v4701_v37  ;;  %v4705_v55 = vmul.f32 %v4701_v37, %v3790_v54  ;;  %v5426_v54 = vld [vmem:[#allocation23_spill] sm:$0xff]  ;;  %v1465_v37 = vpop.xlane.xlu0 %1464 }
 0x39d   :  { %v1753_v45 = vmul.f32 %v5425_v12, %v4711_v60  ;;  %v1758_v22 = vmul.f32 %v5426_v54, %v4687_v33  ;;  %v1757_v18 = vmul.f32 %v5429_v34, %v4711_v60  ;;  %v1503_v26 = vadd.f32 %v4104_v35, %v1465_v37  ;;  %v5433_v35 = vld [vmem:[#allocation21_spill] sm:$0xff] }
 0x39e   :  { %v1751_v20 = vmul.f32 %v5423_v7, %v4705_v55  ;;  %v1755_v19 = vmul.f32 %v5427_v25, %v4705_v55  ;;  %v1759_v3 = vmul.f32 %v5431_v61, %v4705_v55  ;;  %v1761_v37 = vmul.f32 %v5433_v35, %v4711_v60 }
 0x39f   :  { %1891 = vperm.xlu0 %3542, %v1754_v13   ;;  %v5428_v13 = vld [vmem:[#allocation24_spill] sm:$0xff]  ;;  %v3523_v31 = vmul.f32 -1.442695, %v1503_v26  ;;  %v5434_v26 = vld [vmem:[#allocation29_spill] sm:$0xff] }
 0x3a0   :  { %1882 = vperm.xlu1 %3543, %v1751_v20   ;;  %v1760_v20 = vmul.f32 %v5428_v13, %v4695_v63  ;;  %v1766_v36 = vmul.f32 %v5434_v26, %v4687_v33 }
 0x3a1   :  { %3560 = vpow2.f32 %v3523_v31  ;;  %v5436_v31 = vld [vmem:[#allocation31_spill] sm:$0xff] }
 0x3a3   :  { %1897 = vperm.xlu0 %3542, %v1756_v53   ;;  %v1471_v53 = vpop.xlane.xlu0 %1470 }
 0x3a4   :  { %1888 = vperm.xlu1 %3543, %v1753_v45   ;;  %v5430_v45 = vld [vmem:[#allocation25_spill] sm:$0xff] }
 0x3a5   :  { %v1762_v9 = vmul.f32 %v5430_v45, %v4687_v33 }
 0x3a7   :  { %1903 = vperm.xlu0 %3542, %v1758_v22   ;;  %v1468_v22 = vpop.xlane.xlu1 %1467 }
 0x3a8   :  { %1894 = vperm.xlu1 %3543, %v1755_v19   ;;  %v1505_v19 = vadd.f32 %v4065_v6, %v1471_v53  ;;  %v5435_v6 = vld [vmem:[#allocation27_spill] sm:$0xff] }
 0x3ab   :  { %1909 = vperm.xlu0 %3542, %v1760_v20   ;;  %v1504_v20 = vadd.f32 %v4061_v5, %v1468_v22  ;;  %v1474_v62 = vpop.xlane.xlu1 %1473 }
 0x3ac   :  { %1900 = vperm.xlu1 %3543, %v1757_v18   ;;  %v3525_v18 = vmul.f32 -1.442695, %v1505_v19  ;;  %v1506_v53 = vadd.f32 %v4069_v56, %v1474_v62  ;;  %v1768_v19 = vmul.f32 %v5436_v31, %v4695_v63 }
 0x3ae   :  { %3562 = vpow2.f32 %v3525_v18  ;;  %v3526_v22 = vmul.f32 -1.442695, %v1506_v53 }
 0x3af   :  { %1915 = vperm.xlu0 %3542, %v1762_v9   ;;  %v3524_v9 = vmul.f32 -1.442695, %v1504_v20  ;;  %v5440_v20 = vld [vmem:[#allocation35_spill] sm:$0xff] }
 0x3b0   :  { %1906 = vperm.xlu1 %3543, %v1759_v3   ;;  %v1763_v3 = vmul.f32 %v5435_v6, %v4705_v55 }
 0x3b1   :  { %3564 = vpow2.f32 %v3524_v9 }
 0x3b2   :  { %3566 = vpow2.f32 %v3526_v22 }
 0x3b3   :  { %1921 = vperm.xlu0 %3542, %v1764_v17   ;;  %v5437_v17 = vld [vmem:[#allocation28_spill] sm:$0xff] }
 0x3b4   :  { %1912 = vperm.xlu1 %3543, %v1761_v37   ;;  %v1765_v5 = vmul.f32 %v5437_v17, %v4711_v60  ;;  %v3561_v37 = vpop.eup %3560 }
 0x3b5   :  { %v1535_v56 = vadd.f32 1.0, %v3561_v37 }
 0x3b7   :  { %1927 = vperm.xlu0 %3542, %v1766_v36   ;;  %v5439_v36 = vld [vmem:[#allocation30_spill] sm:$0xff]  ;;  %3568 = vrcp.f32 %v1535_v56  ;;  %v1773_v56 = vmul.f32 %v4597_v43, %v4711_v60 }
 0x3b8   :  { %1918 = vperm.xlu1 %3543, %v1763_v3   ;;  %v1767_v18 = vmul.f32 %v5439_v36, %v4705_v55  ;;  %v3563_v62 = vpop.eup %3562  ;;  %v1772_v3 = vmul.f32 %v5440_v20, %v4695_v63 }
 0x3b9   :  { %v1537_v53 = vadd.f32 1.0, %v3563_v62 }
 0x3bb   :  { %1933 = vperm.xlu0 %3542, %v1768_v19   ;;  %v5441_v19 = vld [vmem:[#allocation32_spill] sm:$0xff]  ;;  %v3565_v11 = vpop.eup %3564  ;;  %3570 = vrcp.f32 %v1537_v53  ;;  %v1775_v53 = vmul.f32 %v4601_v41, %v4705_v55 }
 0x3bc   :  { %1924 = vperm.xlu1 %3543, %v1765_v5   ;;  %v1769_v9 = vmul.f32 %v5441_v19, %v4711_v60  ;;  %v1774_v5 = vmul.f32 %v4595_v42, %v4687_v33  ;;  %v1536_v22 = vadd.f32 1.0, %v3565_v11  ;;  %v3567_v50 = vpop.eup %3566  ;;  %v5443_v11 = vld [vmem:[#allocation9_spill] sm:$0xff] }
 0x3bd   :  { %v1538_v62 = vadd.f32 1.0, %v3567_v50  ;;  %v1777_v50 = vmul.f32 %v4607_v30, %v4711_v60 }
 0x3be   :  { %3572 = vrcp.f32 %v1536_v22 }
 0x3bf   :  { %1939 = vperm.xlu0 %3542, %v1770_v59   ;;  %v5442_v59 = vld [vmem:[#allocation34_spill] sm:$0xff]  ;;  %3574 = vrcp.f32 %v1538_v62  ;;  %v1779_v62 = vmul.f32 %v4613_v2, %v4705_v55 }
 0x3c0   :  { %1930 = vperm.xlu1 %3543, %v1767_v18   ;;  %v1771_v37 = vmul.f32 %v5442_v59, %v4705_v55  ;;  %v1776_v18 = vmul.f32 %v4599_v15, %v4695_v63  ;;  %v5446_v55 = vld [vmem:[#allocation12_spill] sm:$0xff] }
 0x3c3   :  { %1945 = vperm.xlu0 %3542, %v1772_v3   ;;  %v1778_v3 = vmul.f32 %v4603_v14, %v4687_v33  ;;  %v5444_v33 = vld [vmem:[#allocation11_spill] sm:$0xff] }
 0x3c4   :  { %1936 = vperm.xlu1 %3543, %v1769_v9   ;;  %v4765_v9 = vpop.eup %3568 }
 0x3c5   :  { %v4775_v22 = vpop.eup %3570 }
 0x3c7   :  { %1951 = vperm.xlu0 %3542, %v1774_v5   ;;  %v4771_v5 = vmul.f32 %v4765_v9, %v5443_v11 }
 0x3c8   :  { %1942 = vperm.xlu1 %3543, %v1771_v37   ;;  %v1780_v37 = vmul.f32 %v4611_v29, %v4695_v63 }
 0x3cb   :  { %1957 = vperm.xlu0 %3542, %v1776_v18   ;;  %v4781_v18 = vmul.f32 %v4775_v22, %v5444_v33 }
 0x3cc   :  { %1948 = vperm.xlu1 %3543, %v1773_v56   ;;  %v1782_v56 = vmul.f32 %v4110_v21, %v4771_v5  ;;  %v1786_v21 = vmul.f32 %v4126_v28, %v4771_v5 }
 0x3cd   :  { %v1784_v63 = vmul.f32 %v4118_v39, %v4781_v18 }
 0x3cf   :  { %1963 = vperm.xlu0 %3542, %v1778_v3   ;;  %v4787_v3 = vpop.eup %3572 }
 0x3d0   :  { %1954 = vperm.xlu1 %3543, %v1775_v53   ;;  %v5445_v53 = vld [vmem:[#allocation10_spill] sm:$0xff] }
 0x3d1   :  { %v4793_v11 = vmul.f32 %v4787_v3, %v5445_v53  ;;  %v4843_v53 = vpop.permute.xlu0 %2627 }
 0x3d3   :  { %1969 = vperm.xlu0 %3542, %v1780_v37   ;;  %v1781_v37 = vmul.f32 %v4617_v4, %v4711_v60  ;;  %v1783_v39 = vmul.f32 %v5423_v7, %v4793_v11  ;;  %v1787_v28 = vmul.f32 %v5427_v25, %v4793_v11  ;;  %v1792_v7 = vmul.f32 %v5428_v13, %v4781_v18 }
 0x3d4   :  { %1960 = vperm.xlu1 %3543, %v1777_v50   ;;  %v4797_v50 = vpop.eup %3574  ;;  %v1795_v13 = vmul.f32 %v5435_v6, %v4793_v11 }
 0x3d5   :  { %v1562_v33 = vmul.f32 %v4797_v50, %v5446_v55 }
 0x3d7   :  { %1975 = vperm.xlu0 %3542, %v1782_v56   ;;  %v1788_v56 = vmul.f32 %v5424_v24, %v4781_v18  ;;  %v1785_v60 = vmul.f32 %v5425_v12, %v1562_v33  ;;  %v1794_v24 = vmul.f32 %v5430_v45, %v4771_v5  ;;  %v1791_v12 = vmul.f32 %v5431_v61, %v4793_v11 }
 0x3d8   :  { %1966 = vperm.xlu1 %3543, %v1779_v62   ;;  %v1790_v62 = vmul.f32 %v5426_v54, %v4771_v5  ;;  %v1796_v54 = vmul.f32 %v5432_v48, %v4781_v18  ;;  %v1793_v25 = vmul.f32 %v5433_v35, %v1562_v33  ;;  %v1800_v61 = vmul.f32 %v5436_v31, %v4781_v18 }
 0x3d9   :  { %v1797_v45 = vmul.f32 %v5437_v17, %v1562_v33  ;;  %v1802_v48 = vmul.f32 %v5438_v0, %v4771_v5  ;;  %v1799_v35 = vmul.f32 %v5439_v36, %v4793_v11  ;;  %v1801_v6 = vmul.f32 %v5441_v19, %v1562_v33 }
 0x3da   :  { %v1806_v31 = vmul.f32 %v4595_v42, %v4771_v5  ;;  %v1803_v17 = vmul.f32 %v5442_v59, %v4793_v11  ;;  %v1808_v0 = vmul.f32 %v4599_v15, %v4781_v18  ;;  %v1805_v36 = vmul.f32 %v4597_v43, %v1562_v33  ;;  %v4851_v59 = vpop.permute.xlu0 %2641 }
 0x3db   :  { %1981 = vperm.xlu0 %3542, %v1784_v63   ;;  %v1789_v63 = vmul.f32 %v5429_v34, %v1562_v33  ;;  %v1798_v34 = vmul.f32 %v5434_v26, %v4771_v5  ;;  %v1804_v26 = vmul.f32 %v5440_v20, %v4781_v18  ;;  %v1810_v20 = vmul.f32 %v4603_v14, %v4771_v5 }
 0x3dc   :  { %1972 = vperm.xlu1 %3543, %v1781_v37   ;;  %v1807_v42 = vmul.f32 %v4601_v41, %v4793_v11  ;;  %v1812_v19 = vmul.f32 %v4611_v29, %v4781_v18  ;;  %v1809_v15 = vmul.f32 %v4607_v30, %v1562_v33  ;;  %v1811_v37 = vmul.f32 %v4613_v2, %v4793_v11  ;;  %v4857_v41 = vpop.permute.xlu1 %2634 }
 0x3dd   :  { %v1813_v5 = vmul.f32 %v4617_v4, %v1562_v33 }
 0x3df   :  { %1987 = vperm.xlu0 %3542, %v1786_v21  }
 0x3e0   :  { %1978 = vperm.xlu1 %3543, %v1783_v39  }
 0x3e3   :  { %1993 = vperm.xlu0 %3542, %v1788_v56  }
 0x3e4   :  { %1984 = vperm.xlu1 %3543, %v1785_v60  }
 0x3e7   :  { %1999 = vperm.xlu0 %3542, %v1790_v62  }
 0x3e8   :  { %1990 = vperm.xlu1 %3543, %v1787_v28  }
 0x3eb   :  { %2005 = vperm.xlu0 %3542, %v1792_v7  }
 0x3ec   :  { %1996 = vperm.xlu1 %3543, %v1789_v63  }
 0x3ef   :  { %2011 = vperm.xlu0 %3542, %v1794_v24  }
 0x3f0   :  { %2002 = vperm.xlu1 %3543, %v1791_v12  }
 0x3f3   :  { %2017 = vperm.xlu0 %3542, %v1796_v54  }
 0x3f4   :  { %2008 = vperm.xlu1 %3543, %v1793_v25  }
 0x3f7   :  { %2023 = vperm.xlu0 %3542, %v1798_v34  }
 0x3f8   :  { %2014 = vperm.xlu1 %3543, %v1795_v13  }
 0x3fb   :  { %2029 = vperm.xlu0 %3542, %v1800_v61   ;;  %v5447_v61 = vld [vmem:[#allocation13_spill] sm:$0xff] }
 0x3fc   :  { %2020 = vperm.xlu1 %3543, %v1797_v45  }
 0x3ff   :  { %2035 = vperm.xlu0 %3542, %v1802_v48  }
 0x400   :  { %2026 = vperm.xlu1 %3543, %v1799_v35  }
 0x403   :  { %2041 = vperm.xlu0 %3542, %v1804_v26  }
 0x404   :  { %2032 = vperm.xlu1 %3543, %v1801_v6  }
 0x407   :  { %2047 = vperm.xlu0 %3542, %v1806_v31  }
 0x408   :  { %2038 = vperm.xlu1 %3543, %v1803_v17  }
 0x40b   :  { %2053 = vperm.xlu0 %3542, %v1808_v0  }
 0x40c   :  { %2044 = vperm.xlu1 %3543, %v1805_v36   ;;  %v5448_v36 = vld [vmem:[#allocation14_spill] sm:$0xff] }
 0x40f   :  { %2059 = vperm.xlu0 %3542, %v1810_v20  }
 0x410   :  { %2050 = vperm.xlu1 %3543, %v1807_v42   ;;  %v5449_v42 = vld [vmem:[#allocation15_spill] sm:$0xff] }
 0x413   :  { %2065 = vperm.xlu0 %3542, %v1812_v19  }
 0x414   :  { %2056 = vperm.xlu1 %3543, %v1809_v15  }
 0x416   :  { %v1880_v43 = vpop.permute.xlu0 %1879 }
 0x417   :  { %v2073_v35 = vrot.slane %v1880_v43, %v3934_v16 }
 0x418   :  { %2062 = vperm.xlu1 %3543, %v1811_v37  }
 0x41a   :  { %v1886_v14 = vpop.permute.xlu0 %1885 }
 0x41b   :  { %v2082_v20 = vrot.slane %v1886_v14, %v5448_v36 }
 0x41c   :  { %2068 = vperm.xlu1 %3543, %v1813_v5  }
 0x41e   :  { %v1892_v21 = vpop.permute.xlu0 %1891 }
 0x41f   :  { %v1883_v55 = vpop.permute.xlu1 %1882  ;;  %v2092_v31 = vrot.slane %v1892_v21, %v3934_v16 }
 0x420   :  { %v2077_v45 = vrot.slane %v1883_v55, %v5447_v61 }
 0x422   :  { %v1898_v29 = vpop.permute.xlu0 %1897  ;;  %v2078_v17 = vsel %vm361_vm0, %v2077_v45, %v2073_v35 }
 0x423   :  { %v1889_v18 = vpop.permute.xlu1 %1888  ;;  %v2083_v21 = vsel %vm368_vm1, %v2082_v20, %v2078_v17 }
 0x424   :  { %v2087_v19 = vrot.slane %v1889_v18, %v5449_v42 }
 0x426   :  { %v1904_v39 = vpop.permute.xlu0 %1903 }
 0x427   :  { %v1895_v56 = vpop.permute.xlu1 %1894  ;;  %v2111_v37 = vrot.slane %v1904_v39, %v3934_v16  ;;  %v2088_v39 = vsel %vm375_vm2, %v2087_v19, %v2083_v21 }
 0x428   :  { %v2096_v26 = vrot.slane %v1895_v56, %v5447_v61  ;;  %v2101_v56 = vrot.slane %v1898_v29, %v5448_v36 }
 0x42a   :  { %v1910_v30 = vpop.permute.xlu0 %1909  ;;  %v2097_v5 = vsel %vm361_vm0, %v2096_v26, %v2092_v31 }
 0x42b   :  { %v1901_v60 = vpop.permute.xlu1 %1900  ;;  %v2120_v26 = vrot.slane %v1910_v30, %v5448_v36 }
 0x42c   :  { %v2106_v45 = vrot.slane %v1901_v60, %v5449_v42 }
 0x42e   :  { %v1916_v62 = vpop.permute.xlu0 %1915 }
 0x42f   :  { %v1907_v28 = vpop.permute.xlu1 %1906 }
 0x430   :  { %v2115_v0 = vrot.slane %v1907_v28, %v5447_v61  ;;  %v2130_v28 = vrot.slane %v1916_v62, %v3934_v16 }
 0x432   :  { %v1922_v7 = vpop.permute.xlu0 %1921  ;;  %v2116_v14 = vsel %vm361_vm0, %v2115_v0, %v2111_v37 }
 0x433   :  { %v1913_v63 = vpop.permute.xlu1 %1912  ;;  %v2139_v20 = vrot.slane %v1922_v7, %v5448_v36  ;;  %v2121_v30 = vsel %vm368_vm1, %v2120_v26, %v2116_v14 }
 0x434   :  { %v2125_v18 = vrot.slane %v1913_v63, %v5449_v42 }
 0x436   :  { %v1928_v2 = vpop.permute.xlu0 %1927 }
 0x437   :  { %v1919_v11 = vpop.permute.xlu1 %1918  ;;  %v2149_v17 = vrot.slane %v1928_v2, %v3934_v16 }
 0x438   :  { %v2134_v43 = vrot.slane %v1919_v11, %v5447_v61  ;;  %v2102_v11 = vsel %vm368_vm1, %v2101_v56, %v2097_v5 }
 0x43a   :  { %v1934_v24 = vpop.permute.xlu0 %1933  ;;  %v2135_v60 = vsel %vm361_vm0, %v2134_v43, %v2130_v28 }
 0x43b   :  { %v1925_v12 = vpop.permute.xlu1 %1924  ;;  %v2140_v43 = vsel %vm368_vm1, %v2139_v20, %v2135_v60 }
 0x43c   :  { %v2144_v62 = vrot.slane %v1925_v12, %v5449_v42  ;;  %v2158_v12 = vrot.slane %v1934_v24, %v5448_v36 }
 0x43e   :  { %v1940_v4 = vpop.permute.xlu0 %1939  ;;  %v2145_v21 = vsel %vm375_vm2, %v2144_v62, %v2140_v43 }
 0x43f   :  { %v1931_v33 = vpop.permute.xlu1 %1930  ;;  %v2168_v19 = vrot.slane %v1940_v4, %v3934_v16 }
 0x440   :  { %v2153_v35 = vrot.slane %v1931_v33, %v5447_v61  ;;  %v2107_v33 = vsel %vm375_vm2, %v2106_v45, %v2102_v11 }
 0x442   :  { %v1946_v54 = vpop.permute.xlu0 %1945  ;;  %v2154_v37 = vsel %vm361_vm0, %v2153_v35, %v2149_v17 }
 0x443   :  { %v1937_v25 = vpop.permute.xlu1 %1936  ;;  %v2177_v4 = vrot.slane %v1946_v54, %v5448_v36 }
 0x444   :  { %v2163_v2 = vrot.slane %v1937_v25, %v5449_v42 }
 0x446   :  { %v1952_v34 = vpop.permute.xlu0 %1951 }
 0x447   :  { %v1943_v13 = vpop.permute.xlu1 %1942  ;;  %v2187_v5 = vrot.slane %v1952_v34, %v3934_v16  ;;  %v2159_v34 = vsel %vm368_vm1, %v2158_v12, %v2154_v37 }
 0x448   :  { %v2172_v29 = vrot.slane %v1943_v13, %v5447_v61  ;;  %v2126_v13 = vsel %vm375_vm2, %v2125_v18, %v2121_v30  ;;  %v2164_v35 = vsel %vm375_vm2, %v2163_v2, %v2159_v34 }
 0x44a   :  { %v1958_v48 = vpop.permute.xlu0 %1957 }
 0x44b   :  { %v1949_v6 = vpop.permute.xlu1 %1948  ;;  %v2196_v24 = vrot.slane %v1958_v48, %v5448_v36 }
 0x44c   :  { %v2182_v7 = vrot.slane %v1949_v6, %v5449_v42  ;;  %v2374_v6 = vsel %vm510_vm3, %v2107_v33, %v2088_v39 }
 0x44d   :  { %v2375_v54 = vsel %vm512_vm4, %v2126_v13, %v2374_v6 }
 0x44e   :  { %v1964_v15 = vpop.permute.xlu0 %1963  ;;  %v2376_v48 = vsel %vm514_vm5, %v2145_v21, %v2375_v54 }
 0x44f   :  { %v1955_v55 = vpop.permute.xlu1 %1954  ;;  %v2206_v14 = vrot.slane %v1964_v15, %v3934_v16 }
 0x450   :  { %v2191_v0 = vrot.slane %v1955_v55, %v5447_v61  ;;  %v2173_v55 = vsel %vm361_vm0, %v2172_v29, %v2168_v19 }
 0x451   :  { %v2178_v26 = vsel %vm368_vm1, %v2177_v4, %v2173_v55 }
 0x452   :  { %v1970_v31 = vpop.permute.xlu0 %1969  ;;  %v2192_v45 = vsel %vm361_vm0, %v2191_v0, %v2187_v5  ;;  %v2183_v11 = vsel %vm375_vm2, %v2182_v7, %v2178_v26  ;;  %v2377_v0 = vsel %vm1385_vm7, %v2164_v35, %v2376_v48 }
 0x453   :  { %v1961_v63 = vpop.permute.xlu1 %1960  ;;  %v2197_v29 = vsel %vm368_vm1, %v2196_v24, %v2192_v45  ;;  %v2215_v15 = vrot.slane %v1970_v31, %v5448_v36  ;;  %v2378_v20 = vsel %vm1387_vm8, %v2183_v11, %v2377_v0 }
 0x454   :  { %v2201_v28 = vrot.slane %v1961_v63, %v5449_v42 }
 0x456   :  { %v1976_v56 = vpop.permute.xlu0 %1975  ;;  %v2202_v62 = vsel %vm375_vm2, %v2201_v28, %v2197_v29 }
 0x457   :  { %v1967_v25 = vpop.permute.xlu1 %1966  ;;  %v2379_v13 = vsel %vm1389_vm9, %v2202_v62, %v2378_v20  ;;  %v2225_v48 = vrot.slane %v1976_v56, %v3934_v16 }
 0x458   :  { %v2210_v18 = vrot.slane %v1967_v25, %v5447_v61 }
 0x45a   :  { %v2211_v17 = vsel %vm361_vm0, %v2210_v18, %v2206_v14  ;;  %v1982_v60 = vpop.permute.xlu0 %1981 }
 0x45b   :  { %v1973_v39 = vpop.permute.xlu1 %1972  ;;  %v2216_v33 = vsel %vm368_vm1, %v2215_v15, %v2211_v17  ;;  %v2234_v20 = vrot.slane %v1982_v60, %v5448_v36 }
 0x45c   :  { %v2220_v63 = vrot.slane %v1973_v39, %v5449_v42 }
 0x45e   :  { %v1988_v30 = vpop.permute.xlu0 %1987  ;;  %v2221_v19 = vsel %vm375_vm2, %v2220_v63, %v2216_v33 }
 0x45f   :  { %v1979_v37 = vpop.permute.xlu1 %1978  ;;  %v2380_v31 = vsel %vm1391_vm10, %v2221_v19, %v2379_v13  ;;  %v2244_v0 = vrot.slane %v1988_v30, %v3934_v16 }
 0x460   :  { %v2391_v2 = vsel %vm2390_vm12, %v2380_v31, 0.0  ;;  %v2229_v17 = vrot.slane %v1979_v37, %v5447_v61 }
 0x461   :  { %2392 = vadd.xlane.f32.xlu0 %v2391_v2 }
 0x462   :  { %v1994_v5 = vpop.permute.xlu0 %1993  ;;  %v2230_v63 = vsel %vm361_vm0, %v2229_v17, %v2225_v48 }
 0x463   :  { %v1985_v12 = vpop.permute.xlu1 %1984  ;;  %v2253_v2 = vrot.slane %v1994_v5, %v5448_v36 }
 0x464   :  { %v2239_v19 = vrot.slane %v1985_v12, %v5449_v42 }
 0x466   :  { %v2000_v43 = vpop.permute.xlu0 %1999 }
 0x467   :  { %v1991_v55 = vpop.permute.xlu1 %1990  ;;  %v2263_v13 = vrot.slane %v2000_v43, %v3934_v16 }
 0x468   :  { %v2248_v15 = vrot.slane %v1991_v55, %v5447_v61  ;;  %v2235_v55 = vsel %vm368_vm1, %v2234_v20, %v2230_v63 }
 0x469   :  { %v2240_v43 = vsel %vm375_vm2, %v2239_v19, %v2235_v55 }
 0x46a   :  { %v2006_v7 = vpop.permute.xlu0 %2005  ;;  %v2249_v37 = vsel %vm361_vm0, %v2248_v15, %v2244_v0 }
 0x46b   :  { %v1997_v21 = vpop.permute.xlu1 %1996  ;;  %v2272_v48 = vrot.slane %v2006_v7, %v5448_v36 }
 0x46c   :  { %v2258_v30 = vrot.slane %v1997_v21, %v5449_v42 }
 0x46e   :  { %v2012_v4 = vpop.permute.xlu0 %2011 }
 0x46f   :  { %v2003_v45 = vpop.permute.xlu1 %2002  ;;  %v2282_v17 = vrot.slane %v2012_v4, %v3934_v16 }
 0x470   :  { %v2267_v33 = vrot.slane %v2003_v45, %v5447_v61 }
 0x472   :  { %v2018_v28 = vpop.permute.xlu0 %2017  ;;  %v2268_v45 = vsel %vm361_vm0, %v2267_v33, %v2263_v13 }
 0x473   :  { %v2009_v25 = vpop.permute.xlu1 %2008  ;;  %v2291_v33 = vrot.slane %v2018_v28, %v5448_v36  ;;  %v2273_v7 = vsel %vm368_vm1, %v2272_v48, %v2268_v45 }
 0x474   :  { %v2277_v60 = vrot.slane %v2009_v25, %v5449_v42 }
 0x476   :  { %v2024_v34 = vpop.permute.xlu0 %2023 }
 0x477   :  { %v2015_v24 = vpop.permute.xlu1 %2014  ;;  %v2301_v0 = vrot.slane %v2024_v34, %v3934_v16 }
 0x478   :  { %v2286_v56 = vrot.slane %v2015_v24, %v5447_v61  ;;  %v2254_v24 = vsel %vm368_vm1, %v2253_v2, %v2249_v37 }
 0x47a   :  { %v2030_v14 = vpop.permute.xlu0 %2029  ;;  %v2287_v21 = vsel %vm361_vm0, %v2286_v56, %v2282_v17 }
 0x47b   :  { %v2021_v18 = vpop.permute.xlu1 %2020  ;;  %v2292_v37 = vsel %vm368_vm1, %v2291_v33, %v2287_v21 }
 0x47c   :  { %v2296_v4 = vrot.slane %v2021_v18, %v5449_v42  ;;  %v2310_v18 = vrot.slane %v2030_v14, %v5448_v36 }
 0x47e   :  { %v2036_v6 = vpop.permute.xlu0 %2035 }
 0x47f   :  { %v2027_v35 = vpop.permute.xlu1 %2026  ;;  %v2320_v20 = vrot.slane %v2036_v6, %v3934_v16 }
 0x480   :  { %v2305_v12 = vrot.slane %v2027_v35, %v5447_v61  ;;  %v2259_v35 = vsel %vm375_vm2, %v2258_v30, %v2254_v24 }
 0x482   :  { %v2042_v26 = vpop.permute.xlu0 %2041  ;;  %v2306_v19 = vsel %vm361_vm0, %v2305_v12, %v2301_v0 }
 0x483   :  { %v2033_v54 = vpop.permute.xlu1 %2032  ;;  %v2329_v6 = vrot.slane %v2042_v26, %v5448_v36 }
 0x484   :  { %v2315_v34 = vrot.slane %v2033_v54, %v5449_v42  ;;  %v2311_v54 = vsel %vm368_vm1, %v2310_v18, %v2306_v19 }
 0x486   :  { %v2048_v11 = vpop.permute.xlu0 %2047 }
 0x487   :  { %v2039_v29 = vpop.permute.xlu1 %2038  ;;  %v2339_v13 = vrot.slane %v2048_v11, %v3934_v16 }
 0x488   :  { %v2324_v5 = vrot.slane %v2039_v29, %v5447_v61  ;;  %v2278_v29 = vsel %vm375_vm2, %v2277_v60, %v2273_v7  ;;  %v2316_v60 = vsel %vm375_vm2, %v2315_v34, %v2311_v54 }
 0x48a   :  { %v2054_v39 = vpop.permute.xlu0 %2053  ;;  %v2325_v56 = vsel %vm361_vm0, %v2324_v5, %v2320_v20 }
 0x48b   :  { %v2045_v62 = vpop.permute.xlu1 %2044  ;;  %v2348_v11 = vrot.slane %v2054_v39, %v5448_v36  ;;  %v2330_v26 = vsel %vm368_vm1, %v2329_v6, %v2325_v56 }
 0x48c   :  { %v2334_v28 = vrot.slane %v2045_v62, %v5449_v42  ;;  %v2381_v62 = vsel %vm510_vm3, %v2259_v35, %v2240_v43 }
 0x48d   :  { %v2382_v12 = vsel %vm512_vm4, %v2278_v29, %v2381_v62 }
 0x48e   :  { %v2060_v15 = vpop.permute.xlu0 %2059  ;;  %v2335_v48 = vsel %vm375_vm2, %v2334_v28, %v2330_v26 }
 0x48f   :  { %v2051_v31 = vpop.permute.xlu1 %2050  ;;  %v2358_v14 = vrot.slane %v2060_v15, %v3934_v16 }
 0x490   :  { %v2343_v63 = vrot.slane %v2051_v31, %v5447_v61  ;;  %v2297_v31 = vsel %vm375_vm2, %v2296_v4, %v2292_v37 }
 0x491   :  { %v2383_v39 = vsel %vm514_vm5, %v2297_v31, %v2382_v12  ;;  %v5453_v12 = vld [vmem:[#allocation39_spill] sm:$0xff] }
 0x492   :  { %v2344_v2 = vsel %vm361_vm0, %v2343_v63, %v2339_v13  ;;  %v2066_v17 = vpop.permute.xlu0 %2065  ;;  %v2384_v43 = vsel %vm1385_vm7, %v2316_v60, %v2383_v39  ;;  %v5452_v60 = vld [vmem:[#allocation38_spill] sm:$0xff]  ;;  %v5455_v39 = vld [vmem:[#allocation41_spill] sm:$0xff] }
 0x493   :  { %v2057_v25 = vpop.permute.xlu1 %2056  ;;  %v2349_v24 = vsel %vm368_vm1, %v2348_v11, %v2344_v2  ;;  %v2367_v15 = vrot.slane %v2066_v17, %v5448_v36  ;;  %v2385_v63 = vsel %vm1387_vm8, %v2335_v48, %v2384_v43  ;;  %v5457_v43 = vld [vmem:[#allocation46_spill] sm:$0xff] }
 0x494   :  { %v2353_v55 = vrot.slane %v2057_v25, %v5449_v42 }
 0x497   :  { %v2063_v30 = vpop.permute.xlu1 %2062 }
 0x498   :  { %v2362_v45 = vrot.slane %v2063_v30, %v5447_v61  ;;  %v2354_v61 = vsel %vm375_vm2, %v2353_v55, %v2349_v24  ;;  %v5454_v24 = vld [vmem:[#allocation40_spill] sm:$0xff] }
 0x499   :  { %v2386_v35 = vsel %vm1389_vm9, %v2354_v61, %v2385_v63  ;;  %v5456_v61 = vld [vmem:[#allocation42_spill] sm:$0xff] }
 0x49a   :  { %v2363_v5 = vsel %vm361_vm0, %v2362_v45, %v2358_v14  ;;  %v5450_v14 = vld [vmem:[#allocation36_spill] sm:$0xff]  ;;  %v5451_v45 = vld [vmem:[#allocation37_spill] sm:$0xff] }
 0x49b   :  { %v2069_v0 = vpop.permute.xlu1 %2068  ;;  %v2368_v4 = vsel %vm368_vm1, %v2367_v15, %v2363_v5 }
 0x49c   :  { %v2372_v21 = vrot.slane %v2069_v0, %v5449_v42 }
 0x49e   :  { %v2373_v25 = vsel %vm375_vm2, %v2372_v21, %v2368_v4  ;;  %v5458_v4 = vld [vmem:[#allocation44_spill] sm:$0xff] }
 0x49f   :  { %v2387_v33 = vsel %vm1391_vm10, %v2373_v25, %v2386_v35  ;;  %v5459_v25 = vld [vmem:[#allocation45_spill] sm:$0xff] }
 0x4a0   :  { %v2394_v7 = vsel %vm2390_vm12, %v2387_v33, 0.0 }
 0x4a1   :  { %2395 = vadd.xlane.f32.xlu1 %v2394_v7 }
 0x4ee   :  { %v2393_v36 = vpop.xlane.xlu0 %2392 }
 0x4ef   :  { %v2406_v20 = vadd.f32 %v4615_v10, %v2393_v36 }
 0x4f1   :  { %v4988_v29 = vmax.f32 %v2406_v20, 0.0 }
 0x4f3   :  { %v2675_v42 = vmul.f32 %v4623_v8, %v4988_v29  ;;  %v2676_v19 = vmul.f32 %v4621_v44, %v4988_v29  ;;  %v2678_v34 = vmul.f32 %v4625_v57, %v4988_v29  ;;  %v2677_v13 = vmul.f32 %v4627_v52, %v4988_v29 }
 0x4f4   :  { %v2680_v18 = vmul.f32 %v4629_v1, %v4988_v29  ;;  %v2679_v37 = vmul.f32 %v4631_v47, %v4988_v29  ;;  %v2682_v56 = vmul.f32 %v4633_v23, %v4988_v29  ;;  %v2681_v28 = vmul.f32 %v4635_v38, %v4988_v29 }
 0x4f5   :  { %2807 = vperm.xlu0 %3542, %v2676_v19   ;;  %2804 = vperm.xlu1 %3543, %v2675_v42   ;;  %v2684_v31 = vmul.f32 %v4637_v40, %v4988_v29  ;;  %v2683_v6 = vmul.f32 %v4639_v58, %v4988_v29  ;;  %v2686_v2 = vmul.f32 %v4641_v49, %v4988_v29 }
 0x4f6   :  { %v2685_v55 = vmul.f32 %v4643_v27, %v4988_v29  ;;  %v2688_v30 = vmul.f32 %v4645_v46, %v4988_v29  ;;  %v2687_v54 = vmul.f32 %v4647_v32, %v4988_v29  ;;  %v2690_v11 = vmul.f32 %v4649_v51, %v4988_v29 }
 0x4f7   :  { %v2689_v17 = vmul.f32 %v5450_v14, %v4988_v29  ;;  %v2692_v62 = vmul.f32 %v5451_v45, %v4988_v29  ;;  %v2691_v26 = vmul.f32 %v5452_v60, %v4988_v29  ;;  %v2694_v48 = vmul.f32 %v5453_v12, %v4988_v29 }
 0x4f8   :  { %v2693_v5 = vmul.f32 %v5454_v24, %v4988_v29  ;;  %v2696_v15 = vmul.f32 %v5455_v39, %v4988_v29  ;;  %v2695_v0 = vmul.f32 %v5456_v61, %v4988_v29  ;;  %v2699_v21 = vmul.f32 %v5457_v43, %v4988_v29 }
 0x4f9   :  { %2813 = vperm.xlu0 %3542, %v2678_v34   ;;  %2810 = vperm.xlu1 %3543, %v2677_v13   ;;  %v2697_v63 = vmul.f32 %v5458_v4, %v4988_v29  ;;  %v2700_v35 = vmul.f32 %v5459_v25, %v4988_v29 }
 0x4fd   :  { %2819 = vperm.xlu0 %3542, %v2680_v18   ;;  %2816 = vperm.xlu1 %3543, %v2679_v37  }
 0x501   :  { %2825 = vperm.xlu0 %3542, %v2682_v56   ;;  %2822 = vperm.xlu1 %3543, %v2681_v28  }
 0x505   :  { %2831 = vperm.xlu0 %3542, %v2684_v31   ;;  %2828 = vperm.xlu1 %3543, %v2683_v6   ;;  %v5461_v31 = vld [vmem:[#allocation47_spill] sm:$0xff] }
 0x506   :  { %v2702_v6 = vmul.f32 %v5461_v31, %v4988_v29 }
 0x509   :  { %2837 = vperm.xlu0 %3542, %v2686_v2   ;;  %2834 = vperm.xlu1 %3543, %v2685_v55  }
 0x50d   :  { %2843 = vperm.xlu0 %3542, %v2688_v30   ;;  %2840 = vperm.xlu1 %3543, %v2687_v54   ;;  %v5462_v30 = vld [vmem:[#allocation49_spill] sm:$0xff] }
 0x50e   :  { %v2703_v54 = vmul.f32 %v5462_v30, %v4988_v29 }
 0x511   :  { %2849 = vperm.xlu0 %3542, %v2690_v11   ;;  %2846 = vperm.xlu1 %3543, %v2689_v17  }
 0x515   :  { %2855 = vperm.xlu0 %3542, %v2692_v62   ;;  %2852 = vperm.xlu1 %3543, %v2691_v26   ;;  %v2705_v26 = vmul.f32 %v4857_v41, %v4988_v29 }
 0x519   :  { %2861 = vperm.xlu0 %3542, %v2694_v48   ;;  %2858 = vperm.xlu1 %3543, %v2693_v5   ;;  %v5463_v48 = vld [vmem:[#allocation43_spill] sm:$0xff] }
 0x51d   :  { %2867 = vperm.xlu0 %3542, %v2696_v15   ;;  %2864 = vperm.xlu1 %3543, %v2695_v0  }
 0x521   :  { %2876 = vperm.xlu0 %3542, %v2699_v21   ;;  %2870 = vperm.xlu1 %3543, %v2697_v63  }
 0x525   :  { %2879 = vperm.xlu1 %3543, %v2700_v35  }
 0x52e   :  { %v2396_v33 = vpop.xlane.xlu1 %2395 }
 0x52f   :  { %v2407_v7 = vadd.f32 %v4615_v10, %v2396_v33 }
 0x531   :  { %v5041_v36 = vmax.f32 %v2407_v7, 0.0 }
 0x533   :  { %v2707_v20 = vmul.f32 %v4623_v8, %v5041_v36  ;;  %v2708_v42 = vmul.f32 %v4621_v44, %v5041_v36  ;;  %v2715_v19 = vmul.f32 %v4639_v58, %v5041_v36  ;;  %v2716_v34 = vmul.f32 %v4637_v40, %v5041_v36  ;;  %v5460_v40 = vld [vmem:[#allocation48_spill] sm:$0xff] }
 0x534   :  { %v2723_v10 = vmul.f32 %v5452_v60, %v5041_v36  ;;  %v2724_v13 = vmul.f32 %v5451_v45, %v5041_v36  ;;  %v2731_v44 = vmul.f32 %v5457_v43, %v5041_v36  ;;  %v2732_v8 = vmul.f32 %v5459_v25, %v5041_v36 }
 0x535   :  { %2900 = vperm.xlu0 %3542, %v2707_v20   ;;  %2903 = vperm.xlu1 %3543, %v2708_v42   ;;  %v2701_v58 = vmul.f32 %v5460_v40, %v4988_v29  ;;  %v2709_v18 = vmul.f32 %v4627_v52, %v5041_v36  ;;  %v2717_v37 = vmul.f32 %v4643_v27, %v5041_v36 }
 0x536   :  { %v2725_v56 = vmul.f32 %v5454_v24, %v5041_v36  ;;  %v2733_v28 = vmul.f32 %v5460_v40, %v5041_v36  ;;  %v2710_v52 = vmul.f32 %v4625_v57, %v5041_v36  ;;  %v2718_v2 = vmul.f32 %v4641_v49, %v5041_v36 }
 0x537   :  { %v2726_v27 = vmul.f32 %v5453_v12, %v5041_v36  ;;  %v2734_v55 = vmul.f32 %v5461_v31, %v5041_v36  ;;  %v2711_v11 = vmul.f32 %v4631_v47, %v5041_v36  ;;  %v2719_v57 = vmul.f32 %v4647_v32, %v5041_v36 }
 0x538   :  { %v2727_v49 = vmul.f32 %v5456_v61, %v5041_v36  ;;  %v2735_v17 = vmul.f32 %v5462_v30, %v5041_v36  ;;  %v2704_v45 = vmul.f32 %v4843_v53, %v4988_v29  ;;  %v2712_v47 = vmul.f32 %v4629_v1, %v5041_v36 }
 0x539   :  { %2924 = vperm.xlu0 %3542, %v2715_v19   ;;  %2927 = vperm.xlu1 %3543, %v2716_v34   ;;  %v2720_v62 = vmul.f32 %v4645_v46, %v5041_v36  ;;  %v2728_v32 = vmul.f32 %v5455_v39, %v5041_v36  ;;  %v2736_v60 = vmul.f32 %v4843_v53, %v5041_v36 }
 0x53a   :  { %v2713_v12 = vmul.f32 %v4635_v38, %v5041_v36  ;;  %v2721_v1 = vmul.f32 %v5450_v14, %v5041_v36  ;;  %v2729_v46 = vmul.f32 %v5458_v4, %v5041_v36  ;;  %v2737_v53 = vmul.f32 %v4857_v41, %v5041_v36 }
 0x53b   :  { %v2698_v24 = vmul.f32 %v5463_v48, %v4988_v29  ;;  %v2706_v38 = vmul.f32 %v4851_v59, %v4988_v29  ;;  %v2714_v14 = vmul.f32 %v4633_v23, %v5041_v36  ;;  %v2722_v41 = vmul.f32 %v4649_v51, %v5041_v36  ;;  %v5126_v23 = vld [vmem:[%s5325_s8] ss:$0 sm:$0xff]  ;;  %s3676_s8 = smov [#allocation5]  }
 0x53c   :  { %v2730_v0 = vmul.f32 %v5463_v48, %v5041_v36  ;;  %v2738_v29 = vmul.f32 %v4851_v59, %v5041_v36  ;;  %s3505_s23 = sshll.u32 %s3676_s8, 4  ;;  %s3506_s23 = int_to_ptr.vmem [resolvable:$true] %s3505_s23 }
 0x53d   :  { %2948 = vperm.xlu0 %3542, %v2723_v10   ;;  %2951 = vperm.xlu1 %3543, %v2724_v13   ;;  %s3646_s1 = scalar_lea.vmem %s3506_s23, 2048  ;;  %p3651_p9 = scmp.lt.s32.totalorder %s3506_s23, %s3506_s23 }
 0x53e   :  { %p3647_p8 = scmp.ne.s32.totalorder %s3506_s23, %s3646_s1  ;;  %p3652_p10 = scmp.lt.s32.totalorder %s3646_s1, %s3646_s1 }
 0x540   :  { %p3653_p11 = por %p3652_p10, %p3651_p9 }
 0x541   :  { %2972 = vperm.xlu0 %3542, %v2731_v44   ;;  %2975 = vperm.xlu1 %3543, %v2732_v8  }
 0x542   :  { %p3654_p12 = pnand %p3653_p11, %p3647_p8 }
 0x545   :  { %2882 = vperm.xlu0 %3542, %v2701_v58   ;;  %2906 = vperm.xlu1 %3543, %v2709_v18  }
 0x549   :  { %2930 = vperm.xlu0 %3542, %v2717_v37   ;;  %2954 = vperm.xlu1 %3543, %v2725_v56  }
 0x54d   :  { %2978 = vperm.xlu0 %3542, %v2733_v28   ;;  %2885 = vperm.xlu1 %3543, %v2702_v6  }
 0x551   :  { %2909 = vperm.xlu0 %3542, %v2710_v52   ;;  %2933 = vperm.xlu1 %3543, %v2718_v2  }
 0x555   :  { %2957 = vperm.xlu0 %3542, %v2726_v27   ;;  %2981 = vperm.xlu1 %3543, %v2734_v55  }
 0x559   :  { %2888 = vperm.xlu0 %3542, %v2703_v54   ;;  %2912 = vperm.xlu1 %3543, %v2711_v11  }
 0x55d   :  { %2936 = vperm.xlu0 %3542, %v2719_v57   ;;  %2960 = vperm.xlu1 %3543, %v2727_v49  }
 0x561   :  { %2984 = vperm.xlu0 %3542, %v2735_v17   ;;  %2891 = vperm.xlu1 %3543, %v2704_v45  }
 0x565   :  { %2915 = vperm.xlu0 %3542, %v2712_v47   ;;  %2939 = vperm.xlu1 %3543, %v2720_v62  }
 0x569   :  { %2963 = vperm.xlu0 %3542, %v2728_v32   ;;  %2987 = vperm.xlu1 %3543, %v2736_v60  }
 0x56d   :  { %2894 = vperm.xlu0 %3542, %v2705_v26   ;;  %2918 = vperm.xlu1 %3543, %v2713_v12  }
 0x571   :  { %2942 = vperm.xlu0 %3542, %v2721_v1   ;;  %2966 = vperm.xlu1 %3543, %v2729_v46  }
 0x574   :  { %v2808_v5 = vpop.permute.xlu0 %2807  ;;  %v2805_v39 = vpop.permute.xlu1 %2804 }
 0x575   :  { %2990 = vperm.xlu0 %3542, %v2737_v53   ;;  %2873 = vperm.xlu1 %3543, %v2698_v24   ;;  %v3002_v40 = vrot.slane %v2808_v5, %v3934_v16  ;;  %v2998_v58 = vrot.slane %v2805_v39, %v3934_v16 }
 0x577   :  { %v3251_v27 = vsel %vm510_vm3, %v3002_v40, %v2998_v58 }
 0x578   :  { %v2814_v15 = vpop.permute.xlu0 %2813  ;;  %v2811_v61 = vpop.permute.xlu1 %2810 }
 0x579   :  { %2897 = vperm.xlu0 %3542, %v2706_v38   ;;  %2921 = vperm.xlu1 %3543, %v2714_v14   ;;  %v3006_v18 = vrot.slane %v2811_v61, %v3934_v16  ;;  %v3010_v55 = vrot.slane %v2814_v15, %v3934_v16 }
 0x57b   :  { %v3252_v54 = vsel %vm512_vm4, %v3006_v18, %v3251_v27 }
 0x57c   :  { %v5119_v43 = vpop.permute.xlu0 %2819  ;;  %v2817_v21 = vpop.permute.xlu1 %2816  ;;  %v3253_v26 = vsel %vm514_vm5, %v3010_v55, %v3252_v54 }
 0x57d   :  { %2945 = vperm.xlu0 %3542, %v2722_v41   ;;  %2969 = vperm.xlu1 %3543, %v2730_v0   ;;  %v3014_v11 = vrot.slane %v2817_v21, %v3934_v16  ;;  %v3018_v60 = vrot.slane %v5119_v43, %v3934_v16 }
 0x57f   :  { %v3254_v1 = vsel %vm1385_vm7, %v3014_v11, %v3253_v26 }
 0x580   :  { %v5128_v4 = vpop.permute.xlu0 %2825  ;;  %v2823_v63 = vpop.permute.xlu1 %2822  ;;  %v3255_v61 = vsel %vm1387_vm8, %v3018_v60, %v3254_v1 }
 0x581   :  { %2993 = vperm.xlu0 %3542, %v2738_v29   ;;  %3346 = vbcast.lane.b32.xlu1 %v5126_v23, 256  ;;  %v3022_v46 = vrot.slane %v2823_v63, %v3934_v16  ;;  %v3026_v14 = vrot.slane %v5128_v4, %v3934_v16 }
 0x583   :  { %v3256_v0 = vsel %vm1389_vm9, %v3022_v46, %v3255_v61 }
 0x584   :  { %v2832_v51 = vpop.permute.xlu0 %2831  ;;  %v2829_v25 = vpop.permute.xlu1 %2828 }
 0x585   :  { %v3034_v7 = vrot.slane %v2832_v51, %v3934_v16  ;;  %v3030_v20 = vrot.slane %v2829_v25, %v3934_v16  ;;  %v3257_v51 = vsel %vm1391_vm10, %v3026_v14, %v3256_v0 }
 0x587   :  { %v3258_v19 = vsel %vm510_vm3, %v3034_v7, %v3030_v20 }
 0x588   :  { %v2838_v35 = vpop.permute.xlu0 %2837  ;;  %v2835_v33 = vpop.permute.xlu1 %2834 }
 0x589   :  { %v3038_v36 = vrot.slane %v2835_v33, %v3934_v16  ;;  %v3042_v34 = vrot.slane %v2838_v35, %v3934_v16  ;;  %v3316_v33 = vsel %vm3315_vm13, %v3257_v51, 0.0 }
 0x58b   :  { %v3259_v13 = vsel %vm512_vm4, %v3038_v36, %v3258_v19 }
 0x58c   :  { %v2844_v59 = vpop.permute.xlu0 %2843  ;;  %v2841_v42 = vpop.permute.xlu1 %2840  ;;  %v3260_v56 = vsel %vm514_vm5, %v3042_v34, %v3259_v13 }
 0x58d   :  { %v3046_v44 = vrot.slane %v2841_v42, %v3934_v16  ;;  %v3050_v37 = vrot.slane %v2844_v59, %v3934_v16 }
 0x58f   :  { %v3261_v31 = vsel %vm1385_vm7, %v3046_v44, %v3260_v56 }
 0x590   :  { %v2850_v10 = vpop.permute.xlu0 %2849  ;;  %v2847_v8 = vpop.permute.xlu1 %2846  ;;  %v3262_v45 = vsel %vm1387_vm8, %v3050_v37, %v3261_v31 }
 0x591   :  { %v3054_v6 = vrot.slane %v2847_v8, %v3934_v16  ;;  %v3058_v57 = vrot.slane %v2850_v10, %v3934_v16 }
 0x593   :  { %v3263_v32 = vsel %vm1389_vm9, %v3054_v6, %v3262_v45 }
 0x594   :  { %v2856_v28 = vpop.permute.xlu0 %2855  ;;  %v2853_v2 = vpop.permute.xlu1 %2852  ;;  %v3264_v24 = vsel %vm1391_vm10, %v3058_v57, %v3263_v32 }
 0x595   :  { %v3066_v52 = vrot.slane %v2856_v28, %v3934_v16  ;;  %v3062_v30 = vrot.slane %v2853_v2, %v3934_v16  ;;  %v3319_v41 = vsel %vm3315_vm13, %v3264_v24, 0.0 }
 0x597   :  { %v3265_v49 = vsel %vm510_vm3, %v3066_v52, %v3062_v30 }
 0x598   :  { %v2862_v17 = vpop.permute.xlu0 %2861  ;;  %v2859_v62 = vpop.permute.xlu1 %2858 }
 0x599   :  { %v3074_v47 = vrot.slane %v2862_v17, %v3934_v16  ;;  %v3070_v12 = vrot.slane %v2859_v62, %v3934_v16 }
 0x59b   :  { %v3266_v53 = vsel %vm512_vm4, %v3070_v12, %v3265_v49 }
 0x59c   :  { %v2868_v48 = vpop.permute.xlu0 %2867  ;;  %v3267_v39 = vsel %vm514_vm5, %v3074_v47, %v3266_v53  ;;  %v2865_v38 = vpop.permute.xlu1 %2864 }
 0x59d   :  { %v3082_v5 = vrot.slane %v2868_v48, %v3934_v16  ;;  %v3078_v15 = vrot.slane %v2865_v38, %v3934_v16 }
 0x59f   :  { %v3268_v43 = vsel %vm1385_vm7, %v3078_v15, %v3267_v39 }
 0x5a0   :  { %3320 = vadd.xlane.f32.xlu0 %v3319_v41  ;;  %v2871_v21 = vpop.permute.xlu1 %2870  ;;  %v3269_v29 = vsel %vm1387_vm8, %v3082_v5, %v3268_v43  ;;  %v2877_v4 = vpop.permute.xlu0 %2876 }
 0x5a1   :  { %v3086_v63 = vrot.slane %v2871_v21, %v3934_v16  ;;  %v3094_v7 = vrot.slane %v2877_v4, %v3934_v16 }
 0x5a3   :  { %v5177_v25 = vsel %vm1389_vm9, %v3086_v63, %v3269_v29 }
 0x5a4   :  { %v2880_v35 = vpop.permute.xlu1 %2879 }
 0x5a5   :  { %v3098_v20 = vrot.slane %v2880_v35, %v3934_v16  ;;  %3317 = vadd.xlane.f32.xlu1 %v3316_v33 }
 0x5a7   :  { %v3272_v59 = vsel %vm510_vm3, %v3098_v20, %v3094_v7 }
 0x5b4   :  { %v2901_v36 = vpop.permute.xlu0 %2900  ;;  %v2904_v42 = vpop.permute.xlu1 %2903 }
 0x5b5   :  { %v3126_v62 = vrot.slane %v2901_v36, %v3934_v16  ;;  %v3130_v60 = vrot.slane %v2904_v42, %v3934_v16 }
 0x5b7   :  { %v3279_v41 = vsel %vm510_vm3, %v3130_v60, %v3126_v62 }
 0x5b8   :  { %v2925_v19 = vpop.permute.xlu0 %2924  ;;  %v2928_v34 = vpop.permute.xlu1 %2927 }
 0x5b9   :  { %v3158_v26 = vrot.slane %v2925_v19, %v3934_v16  ;;  %v3162_v12 = vrot.slane %v2928_v34, %v3934_v16 }
 0x5bb   :  { %v3286_v63 = vsel %vm510_vm3, %v3162_v12, %v3158_v26 }
 0x5bc   :  { %v2949_v10 = vpop.permute.xlu0 %2948  ;;  %v2952_v13 = vpop.permute.xlu1 %2951 }
 0x5bd   :  { %v3190_v1 = vrot.slane %v2949_v10, %v3934_v16  ;;  %v3194_v53 = vrot.slane %v2952_v13, %v3934_v16 }
 0x5bf   :  { %v3293_v51 = vsel %vm510_vm3, %v3194_v53, %v3190_v1 }
 0x5c0   :  { %v2973_v44 = vpop.permute.xlu0 %2972  ;;  %v2976_v8 = vpop.permute.xlu1 %2975 }
 0x5c1   :  { %v3222_v48 = vrot.slane %v2973_v44, %v3934_v16  ;;  %v3226_v24 = vrot.slane %v2976_v8, %v3934_v16 }
 0x5c3   :  { %v3300_v4 = vsel %vm510_vm3, %v3226_v24, %v3222_v48 }
 0x5c4   :  { %v2883_v40 = vpop.permute.xlu0 %2882  ;;  %v2907_v58 = vpop.permute.xlu1 %2906 }
 0x5c5   :  { %v3102_v5 = vrot.slane %v2883_v40, %v3934_v16  ;;  %v3134_v39 = vrot.slane %v2907_v58, %v3934_v16 }
 0x5c7   :  { %v3273_v35 = vsel %vm512_vm4, %v3102_v5, %v3272_v59  ;;  %v3280_v33 = vsel %vm512_vm4, %v3134_v39, %v3279_v41 }
 0x5c8   :  { %v2931_v18 = vpop.permute.xlu0 %2930  ;;  %v2955_v37 = vpop.permute.xlu1 %2954 }
 0x5c9   :  { %v3166_v38 = vrot.slane %v2931_v18, %v3934_v16  ;;  %v3198_v14 = vrot.slane %v2955_v37, %v3934_v16 }
 0x5cb   :  { %v3287_v7 = vsel %vm512_vm4, %v3166_v38, %v3286_v63  ;;  %v3294_v42 = vsel %vm512_vm4, %v3198_v14, %v3293_v51 }
 0x5cc   :  { %v2979_v56 = vpop.permute.xlu0 %2978  ;;  %v2886_v28 = vpop.permute.xlu1 %2885 }
 0x5cd   :  { %v3230_v15 = vrot.slane %v2979_v56, %v3934_v16  ;;  %v3106_v0 = vrot.slane %v2886_v28, %v3934_v16 }
 0x5cf   :  { %v3301_v19 = vsel %vm512_vm4, %v3230_v15, %v3300_v4  ;;  %v3274_v44 = vsel %vm514_vm5, %v3106_v0, %v3273_v35 }
 0x5d0   :  { %v2910_v31 = vpop.permute.xlu0 %2909  ;;  %v2934_v6 = vpop.permute.xlu1 %2933 }
 0x5d1   :  { %v3138_v43 = vrot.slane %v2910_v31, %v3934_v16  ;;  %v3170_v21 = vrot.slane %v2934_v6, %v3934_v16 }
 0x5d3   :  { %v3281_v59 = vsel %vm514_vm5, %v3138_v43, %v3280_v33  ;;  %v3288_v8 = vsel %vm514_vm5, %v3170_v21, %v3287_v7 }
 0x5d4   :  { %v2958_v52 = vpop.permute.xlu0 %2957  ;;  %v5183_v2 = vpop.permute.xlu1 %2981 }
 0x5d5   :  { %v3202_v20 = vrot.slane %v2958_v52, %v3934_v16  ;;  %v3234_v18 = vrot.slane %v5183_v2, %v3934_v16 }
 0x5d7   :  { %v3295_v31 = vsel %vm514_vm5, %v3202_v20, %v3294_v42  ;;  %v3302_v63 = vsel %vm514_vm5, %v3234_v18, %v3301_v19  ;;  %v5464_v18 = vld [vmem:[#allocation50_spill] sm:$0xff] }
 0x5d8   :  { %v2889_v27 = vpop.permute.xlu0 %2888  ;;  %v2913_v55 = vpop.permute.xlu1 %2912 }
 0x5d9   :  { %v3110_v36 = vrot.slane %v2889_v27, %v3934_v16  ;;  %v3142_v34 = vrot.slane %v2913_v55, %v3934_v16 }
 0x5db   :  { %v3275_v6 = vsel %vm1385_vm7, %v3110_v36, %v3274_v44  ;;  %v3282_v55 = vsel %vm1385_vm7, %v3142_v34, %v3281_v59 }
 0x5dc   :  { %v2937_v30 = vpop.permute.xlu0 %2936  ;;  %v5185_v54 = vpop.permute.xlu1 %2960 }
 0x5dd   :  { %v3174_v10 = vrot.slane %v2937_v30, %v3934_v16  ;;  %v3206_v52 = vrot.slane %v5185_v54, %v3934_v16 }
 0x5df   :  { %v3289_v2 = vsel %vm1385_vm7, %v3174_v10, %v3288_v8 }
 0x5e0   :  { %v5187_v11 = vpop.permute.xlu0 %2984  ;;  %v2892_v57 = vpop.permute.xlu1 %2891 }
 0x5e1   :  { %v3114_v40 = vrot.slane %v2892_v57, %v3934_v16  ;;  %v3238_v24 = vrot.slane %v5187_v11, %v3934_v16 }
 0x5e3   :  { %v3276_v62 = vsel %vm1387_vm8, %v3114_v40, %v3275_v6 }
 0x5e4   :  { %v5189_v49 = vpop.permute.xlu0 %2915  ;;  %v5191_v17 = vpop.permute.xlu1 %2939 }
 0x5e5   :  { %v3146_v37 = vrot.slane %v5189_v49, %v3934_v16  ;;  %v3178_v30 = vrot.slane %v5191_v17, %v3934_v16 }
 0x5e7   :  { %v3283_v12 = vsel %vm1387_vm8, %v3146_v37, %v3282_v55  ;;  %v3290_v5 = vsel %vm1387_vm8, %v3178_v30, %v3289_v2 }
 0x5e8   :  { %v5193_v45 = vpop.permute.xlu0 %2963  ;;  %v5195_v47 = vpop.permute.xlu1 %2987 }
 0x5ec   :  { %v2895_v32 = vpop.permute.xlu0 %2894  ;;  %v2919_v46 = vpop.permute.xlu1 %2918 }
 0x5ed   :  { %v3118_v56 = vrot.slane %v2895_v32, %v3934_v16  ;;  %v3150_v27 = vrot.slane %v2919_v46, %v3934_v16  ;;  %v3210_v32 = vrot.slane %v5193_v45, %v3934_v16  ;;  %v3296_v46 = vsel %vm1385_vm7, %v3206_v52, %v3295_v31 }
 0x5ef   :  { %v3284_v48 = vsel %vm1389_vm9, %v3150_v27, %v3283_v12  ;;  %v3297_v15 = vsel %vm1387_vm8, %v3210_v32, %v3296_v46 }
 0x5f0   :  { %v5210_v61 = vpop.permute.xlu0 %2942  ;;  %v5216_v29 = vpop.permute.xlu1 %2966 }
 0x5f1   :  { %v3182_v1 = vrot.slane %v5210_v61, %v3934_v16  ;;  %v3214_v45 = vrot.slane %v5216_v29, %v3934_v16  ;;  %v3242_v61 = vrot.slane %v5195_v47, %v3934_v16  ;;  %v3303_v47 = vsel %vm1385_vm7, %v3238_v24, %v3302_v63 }
 0x5f3   :  { %v3291_v29 = vsel %vm1389_vm9, %v3182_v1, %v3290_v5  ;;  %v3298_v4 = vsel %vm1389_vm9, %v3214_v45, %v3297_v15  ;;  %v3304_v20 = vsel %vm1387_vm8, %v3242_v61, %v3303_v47 }
 0x5f4   :  { %v2991_v13 = vpop.permute.xlu0 %2990  ;;  %v2874_v58 = vpop.permute.xlu1 %2873 }
 0x5f5   :  { %v3090_v28 = vrot.slane %v2874_v58, %v3934_v16  ;;  %v3246_v21 = vrot.slane %v2991_v13, %v3934_v16 }
 0x5f7   :  { %v3271_v49 = vsel %vm1391_vm10, %v3090_v28, %v5177_v25  ;;  %v3277_v25 = vsel %vm1389_vm9, %v3118_v56, %v3276_v62  ;;  %v3305_v19 = vsel %vm1389_vm9, %v3246_v21, %v3304_v20 }
 0x5f8   :  { %v2898_v57 = vpop.permute.xlu0 %2897  ;;  %v2922_v60 = vpop.permute.xlu1 %2921  ;;  %v3322_v26 = vsel %vm3315_vm13, %v3271_v49, 0.0 }
 0x5f9   :  { %v3122_v54 = vrot.slane %v2898_v57, %v3934_v16  ;;  %v3154_v17 = vrot.slane %v2922_v60, %v3934_v16  ;;  %3323 = vadd.xlane.f32.xlu0 %v3322_v26 }
 0x5fb   :  { %v3278_v53 = vsel %vm1391_vm10, %v3122_v54, %v3277_v25  ;;  %v3285_v14 = vsel %vm1391_vm10, %v3154_v17, %v3284_v48 }
 0x5fc   :  { %v2946_v39 = vpop.permute.xlu0 %2945  ;;  %v3325_v38 = vsel %vm3315_vm13, %v3278_v53, 0.0  ;;  %v2970_v0 = vpop.permute.xlu1 %2969  ;;  %v3328_v43 = vsel %vm3315_vm13, %v3285_v14, 0.0 }
 0x5fd   :  { %v3186_v41 = vrot.slane %v2946_v39, %v3934_v16  ;;  %v3218_v11 = vrot.slane %v2970_v0, %v3934_v16  ;;  %3326 = vadd.xlane.f32.xlu0 %v3325_v38  ;;  %3329 = vadd.xlane.f32.xlu1 %v3328_v43 }
 0x5ff   :  { %v3292_v51 = vsel %vm1391_vm10, %v3186_v41, %v3291_v29  ;;  %v3299_v7 = vsel %vm1391_vm10, %v3218_v11, %v3298_v4 }
 0x600   :  { %v2994_v35 = vpop.permute.xlu0 %2993  ;;  %v3331_v33 = vsel %vm3315_vm13, %v3292_v51, 0.0  ;;  %v3334_v42 = vsel %vm3315_vm13, %v3299_v7, 0.0  ;;  %v3347_v13 = vpop.permute.xlu1 %3346  ;;  %v5465_v51 = vld [vmem:[#allocation51_spill] sm:$0xff] }
 0x601   :  { %v3250_v36 = vrot.slane %v2994_v35, %v3934_v16  ;;  %3332 = vadd.xlane.f32.xlu0 %v3331_v33  ;;  %3335 = vadd.xlane.f32.xlu1 %v3334_v42  ;;  %v5466_v33 = vld [vmem:[#allocation53_spill] sm:$0xff] }
 0x603   :  { %v3306_v34 = vsel %vm1391_vm10, %v3250_v36, %v3305_v19 }
 0x604   :  { %v3337_v10 = vsel %vm3315_vm13, %v3306_v34, 0.0  ;;  %v5467_v34 = vld [vmem:[#allocation52_spill] sm:$0xff] }
 0x605   :  { %3338 = vadd.xlane.f32.xlu0 %v3337_v10 }
 0x612   :  { %3354 = vbcast.lane.b32.xlu1 %v5126_v23, 272 }
 0x616   :  { %3358 = vbcast.lane.b32.xlu1 %v5126_v23, 280 }
 0x61b   :  { %3350 = vbcast.lane.b32.xlu0 %v5126_v23, 264 }
 0x62d   :  { %v3321_v56 = vpop.xlane.xlu0 %3320 }
 0x632   :  { %v3318_v44 = vpop.xlane.xlu1 %3317 }
 0x633   :  { %v3364_v16 = vadd.f32 %v3347_v13, %v3318_v44 }
 0x635   :  { %v3529_v59 = vmul.f32 -1.442695, %v3364_v16 }
 0x637   :  { %3576 = vpow2.f32 %v3529_v59 }
 0x641   :  { %v3577_v8 = vpop.eup %3576 }
 0x642   :  { %v3396_v40 = vadd.f32 1.0, %v3577_v8 }
 0x644   :  { %3578 = vrcp.f32 %v3396_v40 }
 0x64e   :  { %v3579_v58 = vpop.eup %3578 }
 0x64f   :  { %v3420_v37 = vmul.f32 %v3579_v58, %v5464_v18  ;;  %v3609_v58 = vld [vmem:[#allocation2 + $0x8] sm:$0xff] }
 0x651   :  { %3430 = vperm.xlu1 %3543, %v3420_v37   ;;  %v3610_v37 = vld [vmem:[#allocation2 + $0x20] sm:$0xff] }
 0x686   :  { %v3324_v28 = vpop.xlane.xlu0 %3323 }
 0x68a   :  { %v3327_v31 = vpop.xlane.xlu0 %3326  ;;  %v3330_v6 = vpop.xlane.xlu1 %3329 }
 0x68b   :  { %v3368_v52 = vadd.f32 %v3347_v13, %v3330_v6 }
 0x68d   :  { %v3533_v23 = vmul.f32 -1.442695, %v3368_v52  ;;  %v3612_v52 = vld [vmem:[#allocation2 + $0x10] sm:$0xff] }
 0x68e   :  { %v3333_v27 = vpop.xlane.xlu0 %3332  ;;  %v3336_v55 = vpop.xlane.xlu1 %3335 }
 0x68f   :  { %3580 = vpow2.f32 %v3533_v23  ;;  %v3614_v23 = vld [vmem:[#allocation2 + $0x40] sm:$0xff] }
 0x692   :  { %v3339_v2 = vpop.xlane.xlu0 %3338  ;;  %v3355_v30 = vpop.permute.xlu1 %3354 }
 0x693   :  { %v3366_v57 = vadd.f32 %v3355_v30, %v3324_v28  ;;  %v3370_v49 = vadd.f32 %v3355_v30, %v3336_v55  ;;  %v3611_v28 = vld [vmem:[#allocation2 + $0x28] sm:$0xff] }
 0x694   :  { %v3615_v30 = vld [vmem:[#allocation2 + $0x48] sm:$0xff] }
 0x695   :  { %v3531_v62 = vmul.f32 -1.442695, %v3366_v57  ;;  %v3535_v32 = vmul.f32 -1.442695, %v3370_v49 }
 0x696   :  { %v3351_v54 = vpop.permute.xlu0 %3350  ;;  %v3359_v60 = vpop.permute.xlu1 %3358 }
 0x697   :  { %3582 = vpow2.f32 %v3531_v62  ;;  %v3365_v26 = vadd.f32 %v3351_v54, %v3321_v56  ;;  %v3369_v12 = vadd.f32 %v3351_v54, %v3333_v27  ;;  %v3367_v1 = vadd.f32 %v3359_v60, %v3327_v31 }
 0x698   :  { %3584 = vpow2.f32 %v3535_v32  ;;  %v3371_v46 = vadd.f32 %v3359_v60, %v3339_v2  ;;  %v3616_v32 = vld [vmem:[#allocation2 + $0x30] sm:$0xff]  ;;  %v3617_v60 = vld [vmem:[#allocation2 + $0x38] sm:$0xff] }
 0x699   :  { %v3530_v17 = vmul.f32 -1.442695, %v3365_v26  ;;  %v3534_v25 = vmul.f32 -1.442695, %v3369_v12  ;;  %v3532_v45 = vmul.f32 -1.442695, %v3367_v1  ;;  %v3581_v48 = vpop.eup %3580 }
 0x69a   :  { %v3536_v53 = vmul.f32 -1.442695, %v3371_v46  ;;  %v3400_v5 = vadd.f32 1.0, %v3581_v48  ;;  %v3618_v12 = vld [vmem:[#allocation2 + $0x60] sm:$0xff]  ;;  %v3621_v48 = vld [vmem:[#allocation2 + $0x58] sm:$0xff] }
 0x69b   :  { %3586 = vpow2.f32 %v3530_v17  ;;  %v3619_v17 = vld [vmem:[#allocation2 + $0x68] sm:$0xff] }
 0x69c   :  { %3588 = vpow2.f32 %v3534_v25 }
 0x69d   :  { %3590 = vpow2.f32 %v3532_v45  ;;  %v3620_v45 = vld [vmem:[#allocation2 + $0x50] sm:$0xff] }
 0x69e   :  { %3592 = vpow2.f32 %v3536_v53 }
 0x6a1   :  { %v3583_v24 = vpop.eup %3582 }
 0x6a2   :  { %v3398_v39 = vadd.f32 1.0, %v3583_v24  ;;  %v3585_v38 = vpop.eup %3584 }
 0x6a3   :  { %v3402_v15 = vadd.f32 1.0, %v3585_v38 }
 0x6a4   :  { %3594 = vrcp.f32 %v3398_v39  ;;  %v3622_v39 = vld [vmem:[#allocation2 + $0x70] sm:$0xff] }
 0x6a5   :  { %v3587_v14 = vpop.eup %3586  ;;  %3596 = vrcp.f32 %v3400_v5 }
 0x6a6   :  { %v3397_v61 = vadd.f32 1.0, %v3587_v14  ;;  %v3589_v41 = vpop.eup %3588  ;;  %v3623_v14 = vld [vmem:[#allocation2 + $0x78] sm:$0xff] }
 0x6a7   :  { %v3591_v0 = vpop.eup %3590  ;;  %v3401_v21 = vadd.f32 1.0, %v3589_v41 }
 0x6a8   :  { %3598 = vrcp.f32 %v3397_v61  ;;  %v3399_v43 = vadd.f32 1.0, %v3591_v0  ;;  %v3593_v11 = vpop.eup %3592 }
 0x6a9   :  { %3600 = vrcp.f32 %v3402_v15  ;;  %v3403_v63 = vadd.f32 1.0, %v3593_v11 }
 0x6aa   :  { %3602 = vrcp.f32 %v3399_v43 }
 0x6ab   :  { %3604 = vrcp.f32 %v3401_v21 }
 0x6ac   :  { %3606 = vrcp.f32 %v3403_v63 }
 0x6ae   :  { %v3595_v29 = vpop.eup %3594 }
 0x6af   :  { %v3422_v4 = vmul.f32 %v3595_v29, %v5465_v51  ;;  %v3597_v47 = vpop.eup %3596 }
 0x6b0   :  { %v3424_v20 = vmul.f32 %v3597_v47, %v4765_v9  ;;  %v3608_v9 = vld [vmem:[#allocation2] sm:$0xff] }
 0x6b1   :  { %3440 = vperm.xlu1 %3543, %v3422_v4  }
 0x6b2   :  { %v3599_v35 = vpop.eup %3598 }
 0x6b3   :  { %v3421_v7 = vmul.f32 %v3599_v35, %v5466_v33  ;;  %v3601_v36 = vpop.eup %3600 }
 0x6b4   :  { %v3603_v42 = vpop.eup %3602  ;;  %v3426_v19 = vmul.f32 %v3601_v36, %v4775_v22 }
 0x6b5   :  { %3435 = vperm.xlu0 %3542, %v3421_v7   ;;  %3450 = vperm.xlu1 %3543, %v3424_v20   ;;  %v3423_v10 = vmul.f32 %v3603_v42, %v5467_v34  ;;  %v3605_v13 = vpop.eup %3604 }
 0x6b6   :  { %v3425_v44 = vmul.f32 %v3605_v13, %v4787_v3  ;;  %v3607_v16 = vpop.eup %3606 }
 0x6b7   :  { %v3427_v59 = vmul.f32 %v3607_v16, %v4797_v50  ;;  %v3613_v50 = vld [vmem:[#allocation2 + $0x18] sm:$0xff] }
 0x6b9   :  { %3460 = vperm.xlu1 %3543, %v3426_v19   ;;  %3445 = vperm.xlu0 %3542, %v3423_v10  }
 0x6bd   :  { %3455 = vperm.xlu0 %3542, %v3425_v44  }
 0x6c1   :  { %3465 = vperm.xlu0 %3542, %v3427_v59  }
 0x6d0   :  { %v3431_v8 = vpop.permute.xlu1 %3430 }
 0x6d1   :  { %v3468_v40 = vmul.f32 %v3608_v9, %v3431_v8  ;;  %v3469_v18 = vmul.f32 %v3609_v58, %v3431_v8 }
 0x6d3   :  { %3484 = vst [vmem:[#allocation5] sm:$0xff] %v3468_v40  ;;  %3485 = vst [vmem:[#allocation5 + $0x8] sm:$0xff] %v3469_v18 }
 0x730   :  { %v3441_v22 = vpop.permute.xlu1 %3440 }
 0x731   :  { %v3472_v56 = vmul.f32 %v3610_v37, %v3441_v22  ;;  %v3473_v31 = vmul.f32 %v3611_v28, %v3441_v22 }
 0x733   :  { %3488 = vst [vmem:[#allocation5 + $0x20] sm:$0xff] %v3472_v56  ;;  %3489 = vst [vmem:[#allocation5 + $0x28] sm:$0xff] %v3473_v31 }
 0x734   :  { %v3436_v3 = vpop.permute.xlu0 %3435  ;;  %v3451_v6 = vpop.permute.xlu1 %3450 }
 0x735   :  { %v3470_v27 = vmul.f32 %v3612_v52, %v3436_v3  ;;  %v3471_v55 = vmul.f32 %v3613_v50, %v3436_v3  ;;  %v3476_v2 = vmul.f32 %v3614_v23, %v3451_v6  ;;  %v3477_v57 = vmul.f32 %v3615_v30, %v3451_v6 }
 0x737   :  { %3486 = vst [vmem:[#allocation5 + $0x10] sm:$0xff] %v3470_v27  ;;  %3487 = vst [vmem:[#allocation5 + $0x18] sm:$0xff] %v3471_v55 }
 0x738   :  { %3492 = vst [vmem:[#allocation5 + $0x40] sm:$0xff] %v3476_v2  ;;  %3493 = vst [vmem:[#allocation5 + $0x48] sm:$0xff] %v3477_v57  ;;  %v3446_v49 = vpop.permute.xlu0 %3445  ;;  %v3461_v62 = vpop.permute.xlu1 %3460 }
 0x739   :  { %v3474_v54 = vmul.f32 %v3616_v32, %v3446_v49  ;;  %v3475_v26 = vmul.f32 %v3617_v60, %v3446_v49  ;;  %v3480_v1 = vmul.f32 %v3618_v12, %v3461_v62  ;;  %v3481_v25 = vmul.f32 %v3619_v17, %v3461_v62 }
 0x73b   :  { %3490 = vst [vmem:[#allocation5 + $0x30] sm:$0xff] %v3474_v54  ;;  %3491 = vst [vmem:[#allocation5 + $0x38] sm:$0xff] %v3475_v26 }
 0x73c   :  { %3496 = vst [vmem:[#allocation5 + $0x60] sm:$0xff] %v3480_v1  ;;  %3497 = vst [vmem:[#allocation5 + $0x68] sm:$0xff] %v3481_v25  ;;  %v3456_v46 = vpop.permute.xlu0 %3455 }
 0x73d   :  { %v3478_v53 = vmul.f32 %v3620_v45, %v3456_v46  ;;  %v3479_v24 = vmul.f32 %v3621_v48, %v3456_v46 }
 0x73f   :  { %3494 = vst [vmem:[#allocation5 + $0x50] sm:$0xff] %v3478_v53  ;;  %3495 = vst [vmem:[#allocation5 + $0x58] sm:$0xff] %v3479_v24 }
 0x740   :  { %v3466_v5 = vpop.permute.xlu0 %3465 }
 0x741   :  { %v3482_v38 = vmul.f32 %v3622_v39, %v3466_v5  ;;  %v3483_v15 = vmul.f32 %v3623_v14, %v3466_v5 }
 0x743   :  { %3498 = vst [vmem:[#allocation5 + $0x70] sm:$0xff] %v3482_v38  ;;  %3499 = vst [vmem:[#allocation5 + $0x78] sm:$0xff] %v3483_v15 }
 0x744   :  { %3657 = shalt.err (!%p3654_p12)
}
 0x745   :  { %s3658_s26 = scalar_lea.hbm %s5326_s9, 2048 }
 0x746   :  { %p3659_p13 = scmp.ne.s32.totalorder %s5326_s9, %s3658_s26  ;;  %p3662_p0 = scmp.lt.u32.totalorder %s3658_s26, %s5326_s9 }
 0x748   :  { %p3664_p1 = pnand %p3662_p0, %p3659_p13 }
 0x74a   :  { %3667 = shalt.err (!%p3664_p1)
}
 0x74b   :  { %3511 = dma.vmem_to_hbm [thread:$0]  %s3506_s23, 2048, %s5326_s9, [#allocation4], %s3673_s19, %s3673_s19, %s3674_s20  }
 0x74c   :  { %3670 = dma.done.wait [#allocation4], 2048  }
 0x74d   :  { %3671 = vsyncadd [#allocation4], 4294965248 }
 0x74e   :  { %3515 = vsyncpa [#allocation3], 1 }
 0x74f   :  { %3516 = vsyncpa [#allocation4], 1 }

</bundles_post_ra>
